<compile_context>
chip_gen: v7x
topology: tpu7x:2x2x1
jax: 0.10.0
libtpu: 0.0.40
codegen_flags: <defaults>
</compile_context>

<pallas_src>
import numpy as np
import jax
import jax.numpy as jnp
from jax.experimental import pallas as pl
from jax.experimental.pallas import tpu as pltpu


def _vmem_limit_bytes():
    """Generation-aware scoped-VMEM limit (v7x: 64 MiB -> ~48 MiB;
    v5e/v6e: 128 MiB -> up to 96 MiB).  Falls back conservatively."""
    try:
        cap = int(pltpu.get_tpu_info().vmem_capacity_bytes)
    except Exception:
        cap = 64 << 20
    return int(min(cap * 3 // 4, 96 << 20))


def _pick_th(H, W, Cin, scratch_budget_bytes):
    """Largest divisor of H whose bf16 in-kernel scratch (im2col patch + halo
    tile) fits the budget.  Big TH => matmul M = TH*W >= 256 where possible
    and fewer ~0.35us grid-step overheads."""
    best = 1
    for d in range(1, H + 1):
        if H % d:
            continue
        patch = d * W * 9 * Cin * 2            # bf16 im2col staging
        halo = (d + 2) * (W + 2) * Cin * 2     # bf16 local padded tile
        if patch + halo <= scratch_budget_bytes:
            best = d
    return best


def _make_conv3x3_bn_relu_kernel(TH, W, Cin, Cout):
    HW = TH * W
    K = 9 * Cin
    bf16 = jnp.bfloat16

    def kernel(x_ref, w_ref, b_ref, o_ref, xloc_ref, patch_ref):
        # x_ref    : (1, H, W, Cin)    bf16  unpadded image, resident per batch elem
        # w_ref    : (9*Cin, Cout)     bf16  tap-major weights, BN scale folded in
        # b_ref    : (1, Cout)         f32   folded BN bias
        # o_ref    : (1, TH, W, Cout)  bf16  output row tile (NHWC)
        # xloc_ref : (TH+2, W+2, Cin)  bf16  local tile with 1-px halo (built here)
        # patch_ref: (TH, W, 9*Cin)    bf16  im2col staging
        ht = pl.program_id(1)
        n_tiles = pl.num_programs(1)
        row0 = pl.multiple_of(ht * TH, TH)

        # ---- Build the padded local tile (halo handled in-kernel, no HBM pad pass).
        # Left / right halo columns are always zero (conv pad = 1).
        xloc_ref[:, 0:1, :] = jnp.zeros((TH + 2, 1, Cin), bf16)
        xloc_ref[:, W + 1:W + 2, :] = jnp.zeros((TH + 2, 1, Cin), bf16)
        # Interior rows of this tile.
        xloc_ref[1:TH + 1, 1:W + 1, :] = x_ref[0, pl.ds(row0, TH), :, :]

        # Top halo row: zero at the image top edge, else the row above the tile.
        @pl.when(ht == 0)
        def _():
            xloc_ref[0:1, 1:W + 1, :] = jnp.zeros((1, W, Cin), bf16)

        @pl.when(ht > 0)
        def _():
            xloc_ref[0:1, 1:W + 1, :] = x_ref[0, pl.ds(row0 - 1, 1), :, :]

        # Bottom halo row: zero at the image bottom edge, else the row below.
        @pl.when(ht == n_tiles - 1)
        def _():
            xloc_ref[TH + 1:TH + 2, 1:W + 1, :] = jnp.zeros((1, W, Cin), bf16)

        @pl.when(ht < n_tiles - 1)
        def _():
            xloc_ref[TH + 1:TH + 2, 1:W + 1, :] = x_ref[0, pl.ds(row0 + TH, 1), :, :]

        # ---- im2col (bf16 end to end):
        #   patch[h, w, (kh*3+kw)*Cin + c] = xloc[h + kh, w + kw, c]
        # TODO(synk): when Cin % 128 != 0 a tap-major (9, TH*W, Cin) scratch with
        # per-tap accumulating matmuls avoids the lane-offset writes (and on v7x
        # the MRB makes the 9-tap accumulation free); keep the single im2col
        # matmul as the v5e/v6e default.
        for kh in range(3):
            rows = xloc_ref[kh:kh + TH, :, :]                 # (TH, W+2, Cin) bf16
            for kw in range(3):
                j = (kh * 3 + kw) * Cin
                patch_ref[:, :, j:j + Cin] = rows[:, kw:kw + W, :]

        patch = patch_ref[...].reshape(HW, K)

        # ---- Single MXU matmul, f32 accumulation; epilogue = +bias, ReLU (f32).
        acc = jnp.dot(patch, w_ref[...], preferred_element_type=jnp.float32)  # (HW, Cout)
        y = jnp.maximum(acc + b_ref[...], 0.0)                # ReLU (ResNet50vd act_layer)
        o_ref[0] = y.reshape(TH, W, Cout).astype(o_ref.dtype)

    return kernel


def conv3x3_bn_relu_nhwc(x_nhwc, conv_w, bn_gamma, bn_beta, bn_mean, bn_var,
                         eps=1e-5, out_dtype=jnp.bfloat16):
    """Fused Conv2d(3x3, s=1, p=1, bias=False) + BatchNorm2d(eval) + ReLU.

    x_nhwc: (N, H, W, Cin) -> (N, H, W, Cout) in `out_dtype` (bf16 by default
    so a stack of these fused layers stays NHWC/bf16 end to end).
    """
    N, H, W, Cin = x_nhwc.shape
    Cout = conv_w.shape[0]

    vmem_limit = _vmem_limit_bytes()
    TH = _pick_th(H, W, Cin, scratch_budget_bytes=vmem_limit // 4)

    # Fold BatchNorm (eval mode, running stats) into the weights + a per-channel bias.
    inv_std = 1.0 / jnp.sqrt(bn_var.astype(jnp.float32) + eps)
    scale = bn_gamma.astype(jnp.float32) * inv_std                    # (Cout,)
    bias = bn_beta.astype(jnp.float32) - bn_mean.astype(jnp.float32) * scale

    # (Cout, Cin, 3, 3) -> (3, 3, Cin, Cout), fold scale, -> (9*Cin, Cout) bf16.
    w = jnp.transpose(conv_w.astype(jnp.float32), (2, 3, 1, 0)) * scale[None, None, None, :]
    w = w.reshape(9 * Cin, Cout).astype(jnp.bfloat16)
    bias2d = bias.reshape(1, Cout)

    x_bf16 = x_nhwc.astype(jnp.bfloat16)

    kernel = _make_conv3x3_bn_relu_kernel(TH, W, Cin, Cout)
    out = pl.pallas_call(
        kernel,
        out_shape=jax.ShapeDtypeStruct((N, H, W, Cout), out_dtype),
        grid_spec=pltpu.PrefetchScalarGridSpec(
            num_scalar_prefetch=0,
            grid=(N, H // TH),
            in_specs=[
                # Whole (unpadded) image per batch element, resident across h tiles.
                pl.BlockSpec((1, H, W, Cin), lambda n, h: (n, 0, 0, 0)),
                pl.BlockSpec((9 * Cin, Cout), lambda n, h: (0, 0)),
                pl.BlockSpec((1, Cout), lambda n, h: (0, 0)),
            ],
            out_specs=pl.BlockSpec((1, TH, W, Cout), lambda n, h: (n, h, 0, 0)),
            scratch_shapes=[
                pltpu.VMEM((TH + 2, W + 2, Cin), jnp.bfloat16),   # halo tile
                pltpu.VMEM((TH, W, 9 * Cin), jnp.bfloat16),       # im2col patch
            ],
        ),
        compiler_params=pltpu.CompilerParams(
            dimension_semantics=("parallel", "parallel"),
            vmem_limit_bytes=vmem_limit,
        ),
    )(x_bf16, w, bias2d)
    return out


def _reference(x_nchw, conv_w, bn_gamma, bn_beta, bn_mean, bn_var, eps=1e-5):
    y = jax.lax.conv_general_dilated(
        x_nchw, conv_w, window_strides=(1, 1), padding=((1, 1), (1, 1)),
        dimension_numbers=("NCHW", "OIHW", "NCHW"))
    g = bn_gamma.reshape(1, -1, 1, 1)
    b = bn_beta.reshape(1, -1, 1, 1)
    m = bn_mean.reshape(1, -1, 1, 1)
    v = bn_var.reshape(1, -1, 1, 1)
    y = g * (y - m) / jnp.sqrt(v + eps) + b
    return jnp.maximum(y, 0.0)          # ReLU (ResNet50vd act_layer=nn.ReLU)


if __name__ == "__main__":
    channel = 4
    c_out = 2 * channel                 # deep-stem pattern: channel -> 2*channel
    N, H, W = 2, 16, 16

    key = jax.random.PRNGKey(0)
    k_x, k_w, k_g, k_b, k_m, k_v = jax.random.split(key, 6)

    x = jax.random.normal(k_x, (N, channel, H, W), dtype=jnp.float32)
    conv_w = jax.random.normal(k_w, (c_out, channel, 3, 3), dtype=jnp.float32) * 0.1
    bn_gamma = 1.0 + 0.1 * jax.random.normal(k_g, (c_out,), dtype=jnp.float32)
    bn_beta = 0.1 * jax.random.normal(k_b, (c_out,), dtype=jnp.float32)
    bn_mean = 0.1 * jax.random.normal(k_m, (c_out,), dtype=jnp.float32)
    bn_var = jnp.abs(1.0 + 0.1 * jax.random.normal(k_v, (c_out,), dtype=jnp.float32))

    # One-time NCHW -> NHWC conversion at the model boundary; inside a ResNet
    # stack activations would stay NHWC/bf16 between fused layers.
    x_nhwc = jnp.transpose(x, (0, 2, 3, 1))

    out_nhwc = conv3x3_bn_relu_nhwc(x_nhwc, conv_w, bn_gamma, bn_beta, bn_mean, bn_var)
    out_nhwc = jax.block_until_ready(out_nhwc)

    ref = _reference(x, conv_w, bn_gamma, bn_beta, bn_mean, bn_var)   # NCHW, f32
    out_nchw = jnp.transpose(out_nhwc.astype(jnp.float32), (0, 3, 1, 2))

    # bf16 operands + bf16 output (f32 accumulation) -> relaxed tolerance vs f32 ref.
    np.testing.assert_allclose(np.asarray(out_nchw), np.asarray(ref),
                               rtol=2e-2, atol=2e-2)
    print("KERNEL_OK")
</pallas_src>

<mosaic_0001>
module attributes {stable_mosaic.version = 11 : i64} {
  func.func @kernel(%arg0: i32, %arg1: i32, %arg2: memref<1x16x16x4xbf16, #tpu.memory_space<vmem>>, %arg3: memref<36x8xbf16, #tpu.memory_space<vmem>>, %arg4: memref<1x8xf32, #tpu.memory_space<vmem>>, %arg5: memref<1x16x16x8xbf16, #tpu.memory_space<vmem>>, %arg6: memref<18x18x4xbf16, #tpu.memory_space<vmem>>, %arg7: memref<16x16x36xbf16, #tpu.memory_space<vmem>>) attributes {dimension_semantics = [#tpu.dimension_semantics<parallel>, #tpu.dimension_semantics<parallel>], iteration_bounds = array<i64: 2, 1>, scalar_prefetch = 0 : i64, scratch_operands = 2 : i64, tpu.core_type = #tpu.core_type<tc>, window_params = [{transform_indices = @transform_0, window_bounds = array<i64: 1, 16, 16, 4>}, {pipeline_mode = #tpu.pipeline_mode<synchronous>, transform_indices = @transform_1, window_bounds = array<i64: 36, 8>}, {pipeline_mode = #tpu.pipeline_mode<synchronous>, transform_indices = @transform_2, window_bounds = array<i64: 1, 8>}, {transform_indices = @transform_3, window_bounds = array<i64: 1, 16, 16, 8>}]} {
    %c16_i32 = arith.constant 16 : i32
    %0 = arith.muli %arg1, %c16_i32 : i32
    %1 = tpu.assume_multiple %0, 16 : i32
    %cst = arith.constant 0.000000e+00 : bf16
    %2 = vector.broadcast %cst : bf16 to vector<18x1x4xbf16>
    %c0 = arith.constant 0 : index
    %c0_0 = arith.constant 0 : index
    %c0_1 = arith.constant 0 : index
    %3 = vector.load %arg6[%c0, %c0_0, %c0_1] : memref<18x18x4xbf16, #tpu.memory_space<vmem>>, vector<18x1x4xbf16>
    tpu.vector_store %arg6[%c0, %c0_0, %c0_1], %2 {strides = array<i32>} : memref<18x18x4xbf16, #tpu.memory_space<vmem>>, vector<18x1x4xbf16>,
    %cst_2 = arith.constant 0.000000e+00 : bf16
    %4 = vector.broadcast %cst_2 : bf16 to vector<18x1x4xbf16>
    %c0_3 = arith.constant 0 : index
    %c17 = arith.constant 17 : index
    %c0_4 = arith.constant 0 : index
    %5 = vector.load %arg6[%c0_3, %c17, %c0_4] : memref<18x18x4xbf16, #tpu.memory_space<vmem>>, vector<18x1x4xbf16>
    tpu.vector_store %arg6[%c0_3, %c17, %c0_4], %4 {strides = array<i32>} : memref<18x18x4xbf16, #tpu.memory_space<vmem>>, vector<18x1x4xbf16>,
    %c0_5 = arith.constant 0 : index
    %6 = arith.index_cast %1 : i32 to index
    %c0_6 = arith.constant 0 : index
    %c0_7 = arith.constant 0 : index
    %7 = vector.load %arg2[%c0_5, %6, %c0_6, %c0_7] : memref<1x16x16x4xbf16, #tpu.memory_space<vmem>>, vector<1x16x16x4xbf16>
    %8 = vector.shape_cast %7 : vector<1x16x16x4xbf16> to vector<16x16x4xbf16>
    %c1 = arith.constant 1 : index
    %c1_8 = arith.constant 1 : index
    %c0_9 = arith.constant 0 : index
    %9 = vector.load %arg6[%c1, %c1_8, %c0_9] : memref<18x18x4xbf16, #tpu.memory_space<vmem>>, vector<16x16x4xbf16>
    tpu.vector_store %arg6[%c1, %c1_8, %c0_9], %8 {strides = array<i32>} : memref<18x18x4xbf16, #tpu.memory_space<vmem>>, vector<16x16x4xbf16>,
    %c0_i32 = arith.constant 0 : i32
    %10 = arith.cmpi eq, %arg1, %c0_i32 : i32
    %11 = arith.extui %10 : i1 to i32
    %c0_i32_10 = arith.constant 0 : i32
    %12 = arith.cmpi ne, %11, %c0_i32_10 : i32
    scf.if %12 {
      %cst_57 = arith.constant 0.000000e+00 : bf16
      %57 = vector.broadcast %cst_57 : bf16 to vector<1x16x4xbf16>
      %c0_58 = arith.constant 0 : index
      %c1_59 = arith.constant 1 : index
      %c0_60 = arith.constant 0 : index
      %58 = vector.load %arg6[%c0_58, %c1_59, %c0_60] : memref<18x18x4xbf16, #tpu.memory_space<vmem>>, vector<1x16x4xbf16>
      tpu.vector_store %arg6[%c0_58, %c1_59, %c0_60], %57 {strides = array<i32>} : memref<18x18x4xbf16, #tpu.memory_space<vmem>>, vector<1x16x4xbf16>,
    } else {
    }
    %c0_i32_11 = arith.constant 0 : i32
    %13 = arith.cmpi sgt, %arg1, %c0_i32_11 : i32
    %14 = arith.extui %13 : i1 to i32
    %c0_i32_12 = arith.constant 0 : i32
    %15 = arith.cmpi ne, %14, %c0_i32_12 : i32
    scf.if %15 {
      %c1_i32 = arith.constant 1 : i32
      %57 = arith.subi %1, %c1_i32 : i32
      %c0_57 = arith.constant 0 : index
      %58 = arith.index_cast %57 : i32 to index
      %c0_58 = arith.constant 0 : index
      %c0_59 = arith.constant 0 : index
      %59 = vector.load %arg2[%c0_57, %58, %c0_58, %c0_59] : memref<1x16x16x4xbf16, #tpu.memory_space<vmem>>, vector<1x1x16x4xbf16>
      %60 = vector.shape_cast %59 : vector<1x1x16x4xbf16> to vector<1x16x4xbf16>
      %c0_60 = arith.constant 0 : index
      %c1_61 = arith.constant 1 : index
      %c0_62 = arith.constant 0 : index
      %61 = vector.load %arg6[%c0_60, %c1_61, %c0_62] : memref<18x18x4xbf16, #tpu.memory_space<vmem>>, vector<1x16x4xbf16>
      tpu.vector_store %arg6[%c0_60, %c1_61, %c0_62], %60 {strides = array<i32>} : memref<18x18x4xbf16, #tpu.memory_space<vmem>>, vector<1x16x4xbf16>,
    } else {
    }
    %c0_i32_13 = arith.constant 0 : i32
    %16 = arith.cmpi eq, %arg1, %c0_i32_13 : i32
    %17 = arith.extui %16 : i1 to i32
    %c0_i32_14 = arith.constant 0 : i32
    %18 = arith.cmpi ne, %17, %c0_i32_14 : i32
    scf.if %18 {
      %cst_57 = arith.constant 0.000000e+00 : bf16
      %57 = vector.broadcast %cst_57 : bf16 to vector<1x16x4xbf16>
      %c17_58 = arith.constant 17 : index
      %c1_59 = arith.constant 1 : index
      %c0_60 = arith.constant 0 : index
      %58 = vector.load %arg6[%c17_58, %c1_59, %c0_60] : memref<18x18x4xbf16, #tpu.memory_space<vmem>>, vector<1x16x4xbf16>
      tpu.vector_store %arg6[%c17_58, %c1_59, %c0_60], %57 {strides = array<i32>} : memref<18x18x4xbf16, #tpu.memory_space<vmem>>, vector<1x16x4xbf16>,
    } else {
    }
    %c0_i32_15 = arith.constant 0 : i32
    %19 = arith.cmpi slt, %arg1, %c0_i32_15 : i32
    %20 = arith.extui %19 : i1 to i32
    %c0_i32_16 = arith.constant 0 : i32
    %21 = arith.cmpi ne, %20, %c0_i32_16 : i32
    scf.if %21 {
      %c16_i32_57 = arith.constant 16 : i32
      %57 = arith.addi %1, %c16_i32_57 : i32
      %c0_58 = arith.constant 0 : index
      %58 = arith.index_cast %57 : i32 to index
      %c0_59 = arith.constant 0 : index
      %c0_60 = arith.constant 0 : index
      %59 = vector.load %arg2[%c0_58, %58, %c0_59, %c0_60] : memref<1x16x16x4xbf16, #tpu.memory_space<vmem>>, vector<1x1x16x4xbf16>
      %60 = vector.shape_cast %59 : vector<1x1x16x4xbf16> to vector<1x16x4xbf16>
      %c17_61 = arith.constant 17 : index
      %c1_62 = arith.constant 1 : index
      %c0_63 = arith.constant 0 : index
      %61 = vector.load %arg6[%c17_61, %c1_62, %c0_63] : memref<18x18x4xbf16, #tpu.memory_space<vmem>>, vector<1x16x4xbf16>
      tpu.vector_store %arg6[%c17_61, %c1_62, %c0_63], %60 {strides = array<i32>} : memref<18x18x4xbf16, #tpu.memory_space<vmem>>, vector<1x16x4xbf16>,
    } else {
    }
    %c0_17 = arith.constant 0 : index
    %c0_18 = arith.constant 0 : index
    %c0_19 = arith.constant 0 : index
    %22 = vector.load %arg6[%c0_17, %c0_18, %c0_19] : memref<18x18x4xbf16, #tpu.memory_space<vmem>>, vector<16x18x4xbf16>
    %23 = vector.extract_strided_slice %22 {offsets = [0, 0, 0], sizes = [16, 16, 4], strides = [1, 1, 1]} : vector<16x18x4xbf16> to vector<16x16x4xbf16>
    %c0_20 = arith.constant 0 : index
    %c0_21 = arith.constant 0 : index
    %c0_22 = arith.constant 0 : index
    %24 = vector.load %arg7[%c0_20, %c0_21, %c0_22] : memref<16x16x36xbf16, #tpu.memory_space<vmem>>, vector<16x16x4xbf16>
    tpu.vector_store %arg7[%c0_20, %c0_21, %c0_22], %23 {strides = array<i32>} : memref<16x16x36xbf16, #tpu.memory_space<vmem>>, vector<16x16x4xbf16>,
    %25 = vector.extract_strided_slice %22 {offsets = [0, 1, 0], sizes = [16, 16, 4], strides = [1, 1, 1]} : vector<16x18x4xbf16> to vector<16x16x4xbf16>
    %c0_23 = arith.constant 0 : index
    %c0_24 = arith.constant 0 : index
    %c4 = arith.constant 4 : index
    %26 = vector.load %arg7[%c0_23, %c0_24, %c4] : memref<16x16x36xbf16, #tpu.memory_space<vmem>>, vector<16x16x4xbf16>
    tpu.vector_store %arg7[%c0_23, %c0_24, %c4], %25 {strides = array<i32>} : memref<16x16x36xbf16, #tpu.memory_space<vmem>>, vector<16x16x4xbf16>,
    %27 = vector.extract_strided_slice %22 {offsets = [0, 2, 0], sizes = [16, 16, 4], strides = [1, 1, 1]} : vector<16x18x4xbf16> to vector<16x16x4xbf16>
    %c0_25 = arith.constant 0 : index
    %c0_26 = arith.constant 0 : index
    %c8 = arith.constant 8 : index
    %28 = vector.load %arg7[%c0_25, %c0_26, %c8] : memref<16x16x36xbf16, #tpu.memory_space<vmem>>, vector<16x16x4xbf16>
    tpu.vector_store %arg7[%c0_25, %c0_26, %c8], %27 {strides = array<i32>} : memref<16x16x36xbf16, #tpu.memory_space<vmem>>, vector<16x16x4xbf16>,
    %c1_27 = arith.constant 1 : index
    %c0_28 = arith.constant 0 : index
    %c0_29 = arith.constant 0 : index
    %29 = vector.load %arg6[%c1_27, %c0_28, %c0_29] : memref<18x18x4xbf16, #tpu.memory_space<vmem>>, vector<16x18x4xbf16>
    %30 = vector.extract_strided_slice %29 {offsets = [0, 0, 0], sizes = [16, 16, 4], strides = [1, 1, 1]} : vector<16x18x4xbf16> to vector<16x16x4xbf16>
    %c0_30 = arith.constant 0 : index
    %c0_31 = arith.constant 0 : index
    %c12 = arith.constant 12 : index
    %31 = vector.load %arg7[%c0_30, %c0_31, %c12] : memref<16x16x36xbf16, #tpu.memory_space<vmem>>, vector<16x16x4xbf16>
    tpu.vector_store %arg7[%c0_30, %c0_31, %c12], %30 {strides = array<i32>} : memref<16x16x36xbf16, #tpu.memory_space<vmem>>, vector<16x16x4xbf16>,
    %32 = vector.extract_strided_slice %29 {offsets = [0, 1, 0], sizes = [16, 16, 4], strides = [1, 1, 1]} : vector<16x18x4xbf16> to vector<16x16x4xbf16>
    %c0_32 = arith.constant 0 : index
    %c0_33 = arith.constant 0 : index
    %c16 = arith.constant 16 : index
    %33 = vector.load %arg7[%c0_32, %c0_33, %c16] : memref<16x16x36xbf16, #tpu.memory_space<vmem>>, vector<16x16x4xbf16>
    tpu.vector_store %arg7[%c0_32, %c0_33, %c16], %32 {strides = array<i32>} : memref<16x16x36xbf16, #tpu.memory_space<vmem>>, vector<16x16x4xbf16>,
    %34 = vector.extract_strided_slice %29 {offsets = [0, 2, 0], sizes = [16, 16, 4], strides = [1, 1, 1]} : vector<16x18x4xbf16> to vector<16x16x4xbf16>
    %c0_34 = arith.constant 0 : index
    %c0_35 = arith.constant 0 : index
    %c20 = arith.constant 20 : index
    %35 = vector.load %arg7[%c0_34, %c0_35, %c20] : memref<16x16x36xbf16, #tpu.memory_space<vmem>>, vector<16x16x4xbf16>
    tpu.vector_store %arg7[%c0_34, %c0_35, %c20], %34 {strides = array<i32>} : memref<16x16x36xbf16, #tpu.memory_space<vmem>>, vector<16x16x4xbf16>,
    %c2 = arith.constant 2 : index
    %c0_36 = arith.constant 0 : index
    %c0_37 = arith.constant 0 : index
    %36 = vector.load %arg6[%c2, %c0_36, %c0_37] : memref<18x18x4xbf16, #tpu.memory_space<vmem>>, vector<16x18x4xbf16>
    %37 = vector.extract_strided_slice %36 {offsets = [0, 0, 0], sizes = [16, 16, 4], strides = [1, 1, 1]} : vector<16x18x4xbf16> to vector<16x16x4xbf16>
    %c0_38 = arith.constant 0 : index
    %c0_39 = arith.constant 0 : index
    %c24 = arith.constant 24 : index
    %38 = vector.load %arg7[%c0_38, %c0_39, %c24] : memref<16x16x36xbf16, #tpu.memory_space<vmem>>, vector<16x16x4xbf16>
    tpu.vector_store %arg7[%c0_38, %c0_39, %c24], %37 {strides = array<i32>} : memref<16x16x36xbf16, #tpu.memory_space<vmem>>, vector<16x16x4xbf16>,
    %39 = vector.extract_strided_slice %36 {offsets = [0, 1, 0], sizes = [16, 16, 4], strides = [1, 1, 1]} : vector<16x18x4xbf16> to vector<16x16x4xbf16>
    %c0_40 = arith.constant 0 : index
    %c0_41 = arith.constant 0 : index
    %c28 = arith.constant 28 : index
    %40 = vector.load %arg7[%c0_40, %c0_41, %c28] : memref<16x16x36xbf16, #tpu.memory_space<vmem>>, vector<16x16x4xbf16>
    tpu.vector_store %arg7[%c0_40, %c0_41, %c28], %39 {strides = array<i32>} : memref<16x16x36xbf16, #tpu.memory_space<vmem>>, vector<16x16x4xbf16>,
    %41 = vector.extract_strided_slice %36 {offsets = [0, 2, 0], sizes = [16, 16, 4], strides = [1, 1, 1]} : vector<16x18x4xbf16> to vector<16x16x4xbf16>
    %c0_42 = arith.constant 0 : index
    %c0_43 = arith.constant 0 : index
    %c32 = arith.constant 32 : index
    %42 = vector.load %arg7[%c0_42, %c0_43, %c32] : memref<16x16x36xbf16, #tpu.memory_space<vmem>>, vector<16x16x4xbf16>
    tpu.vector_store %arg7[%c0_42, %c0_43, %c32], %41 {strides = array<i32>} : memref<16x16x36xbf16, #tpu.memory_space<vmem>>, vector<16x16x4xbf16>,
    %c0_44 = arith.constant 0 : index
    %c0_45 = arith.constant 0 : index
    %c0_46 = arith.constant 0 : index
    %43 = vector.load %arg7[%c0_44, %c0_45, %c0_46] : memref<16x16x36xbf16, #tpu.memory_space<vmem>>, vector<16x16x36xbf16>
    %44 = vector.shape_cast %43 : vector<16x16x36xbf16> to vector<256x36xbf16>
    %c0_47 = arith.constant 0 : index
    %c0_48 = arith.constant 0 : index
    %45 = vector.load %arg3[%c0_47, %c0_48] : memref<36x8xbf16, #tpu.memory_space<vmem>>, vector<36x8xbf16>
    %cst_49 = arith.constant dense<0.000000e+00> : vector<256x8xf32>
    %46 = tpu.matmul %44, %45, %cst_49 {dimension_numbers = #tpu.dot_dimension_numbers<[1], [0], [0], [1], [0, 0, 1, 1], [], []>} : vector<256x36xbf16>, vector<36x8xbf16>, vector<256x8xf32> -> vector<256x8xf32>
    %c0_50 = arith.constant 0 : index
    %c0_51 = arith.constant 0 : index
    %47 = vector.load %arg4[%c0_50, %c0_51] : memref<1x8xf32, #tpu.memory_space<vmem>>, vector<1x8xf32>
    %48 = vector.broadcast %47 : vector<1x8xf32> to vector<256x8xf32>
    %49 = arith.addf %46, %48 : vector<256x8xf32>
    %cst_52 = arith.constant 0.000000e+00 : f32
    %50 = vector.broadcast %cst_52 : f32 to vector<256x8xf32>
    %51 = arith.maximumf %49, %50 : vector<256x8xf32>
    %52 = vector.shape_cast %51 : vector<256x8xf32> to vector<16x16x8xf32>
    %53 = arith.truncf %52 : vector<16x16x8xf32> to vector<16x16x8xbf16>
    %c0_53 = arith.constant 0 : index
    %c0_54 = arith.constant 0 : index
    %c0_55 = arith.constant 0 : index
    %c0_56 = arith.constant 0 : index
    %54 = vector.load %arg5[%c0_53, %c0_54, %c0_55, %c0_56] : memref<1x16x16x8xbf16, #tpu.memory_space<vmem>>, vector<1x16x16x8xbf16>
    %55 = vector.shape_cast %54 : vector<1x16x16x8xbf16> to vector<16x16x8xbf16>
    %56 = vector.shape_cast %53 : vector<16x16x8xbf16> to vector<1x16x16x8xbf16>
    tpu.vector_store %arg5[%c0_53, %c0_54, %c0_55, %c0_56], %56 {strides = array<i32>} : memref<1x16x16x8xbf16, #tpu.memory_space<vmem>>, vector<1x16x16x8xbf16>,
    return
  }
  func.func @transform_0(%arg0: i32, %arg1: i32) -> (i32, i32, i32, i32) {
    %c0_i32 = arith.constant 0 : i32
    %c0_i32_0 = arith.constant 0 : i32
    %c0_i32_1 = arith.constant 0 : i32
    %c0_i32_2 = arith.constant 0 : i32
    return %arg0, %c0_i32, %c0_i32_0, %c0_i32_1 : i32, i32, i32, i32
  }
  func.func @transform_1(%arg0: i32, %arg1: i32) -> (i32, i32) {
    %c0_i32 = arith.constant 0 : i32
    %c0_i32_0 = arith.constant 0 : i32
    %c0_i32_1 = arith.constant 0 : i32
    return %c0_i32, %c0_i32_0 : i32, i32
  }
  func.func @transform_2(%arg0: i32, %arg1: i32) -> (i32, i32) {
    %c0_i32 = arith.constant 0 : i32
    %c0_i32_0 = arith.constant 0 : i32
    %c0_i32_1 = arith.constant 0 : i32
    return %c0_i32, %c0_i32_0 : i32, i32
  }
  func.func @transform_3(%arg0: i32, %arg1: i32) -> (i32, i32, i32, i32) {
    %c0_i32 = arith.constant 0 : i32
    %c0_i32_0 = arith.constant 0 : i32
    %c0_i32_1 = arith.constant 0 : i32
    return %arg0, %arg1, %c0_i32, %c0_i32_0 : i32, i32, i32, i32
  }
}

</mosaic_0001>

<bundles_post_ra>
// kernel: tpu_custom_call.1
= control target key start
LH: loop header
LB: loop body
LE: loop exit
PB: predicated region body
PF: predicated region fallthrough
CT: control target
= control target key end

     0   :  { %s3677_s12 = smov 0   ;;  %s3679_s13 = smov 0   ;;  %s5054_s0 = inlined_call_operand.vmem [shape: bf16[2,16,16,4], index: 0, kind: input, shape index: {}]   ;;  %s5055_s1 = inlined_call_operand.vmem [shape: bf16[36,8], index: 1, kind: input, shape index: {}]   ;;  %s5056_s2 = inlined_call_operand.vmem [shape: f32[1,8], index: 2, kind: input, shape index: {}]   ;;  %s5057_s3 = inlined_call_operand.vmem [shape: bf16[2,16,16,8], index: 3, kind: output, shape index: {}]  }
   0x1   :  { %s3681_s14 = smov 0  }
   0x2 LB: > { %s25_s15 = sadd.s32 1, %s3642_s13  ;;  %p3234_p0 = scmp.ge.s32.totalorder %s3646_s14, 1  ;;  %s3646_s14 = sphi %s3681_s14, %s13_s14   ;;  %s3642_s13 = sphi %s3679_s13, %s5067_s13   ;;  %s3638_s12 = sphi %s3677_s12, %s5066_s12  }
   0x3   : > { %p27_p1 = scmp.ge.s32.totalorder %s25_s15, 2  ;;  %p151_p2 = scmp.lt.s32.totalorder %s3646_s14, 3 }
   0x5   : > { %s5069_s15 = smov (%p27_p1, %s25_s15), 0  ;;  %p152_p3 = pnand %p3234_p0, %p151_p2 }
   0x6   : > { %p180_p4 = scmp.lt.s32.totalorder (!%p152_p3), %s3638_s12, 1  ;;  %vm198_vm0 = vcmask (!%p152_p3), 24576   ;;  %vm199_vm1 = vsmask.f32 (!%p152_p3), 256  ;;  %v228_v0 = vld [vmem:[#allocation2 + $0x6c] sm:$0x1] (!%p152_p3) }
   0x7   : > { %155 = sbr.rel (%p152_p3) target bundleno = 648 (0x288), region = 32  ;;  %vm3697_vm2 = vmand (!%p152_p3), %vm198_vm0, %vm199_vm1  ;;  %vm255_vm3 = vsmask.f32 (!%p152_p3), 7938  ;;  %v204_v3 = vld [vmem:[#allocation2 + $0xc] sm:$0x1] (!%p152_p3)  ;;  %vm669_vm6 = vcmask (!%p152_p3), 27648  }
   0x8   : > { %v229_v2 = vsel (!%p152_p3), %vm3697_vm2, 0, %v228_v0  ;;  %v231_v4 = vld [vmem:[#allocation2 + $0x78] sm:$0x1] (!%p152_p3)  ;;  %v205_v5 = vsel (!%p152_p3), %vm3697_vm2, 0, %v204_v3  ;;  %v225_v8 = vld [vmem:[#allocation2 + $0x60] sm:$0x1] (!%p152_p3)  ;;  %vm3716_vm4 = vmand (!%p152_p3), %vm198_vm0, %vm255_vm3 }
   0x9   : > { %230 = vst [vmem:[#allocation2 + $0x6c] sm:$0x1] (!%p152_p3), %v229_v2  ;;  %v232_v6 = vsel (!%p152_p3), %vm3697_vm2, 0, %v231_v4  ;;  %v207_v7 = vld [vmem:[#allocation2 + $0x18] sm:$0x1] (!%p152_p3)  ;;  %v226_v10 = vsel (!%p152_p3), %vm3697_vm2, 0, %v225_v8  ;;  %vm3745_vm8 = vmand (!%p152_p3), %vm669_vm6, %vm255_vm3 }
   0xa   : > { %206 = vst [vmem:[#allocation2 + $0xc] sm:$0x1] (!%p152_p3), %v205_v5  ;;  %233 = vst [vmem:[#allocation2 + $0x78] sm:$0x1] (!%p152_p3), %v232_v6  ;;  %v208_v9 = vsel (!%p152_p3), %vm3697_vm2, 0, %v207_v7  ;;  %s3649_s20 = smov (!%p152_p3), 12  }
   0xb   : > { %v281_v12 = vld [vmem:[#allocation2 + $0x68] sm:$0x1] (!%p152_p3)  ;;  %vm346_vm5 = vsmask.f32 (!%p152_p3), 4368  ;;  %209 = vst [vmem:[#allocation2 + $0x18] sm:$0x1] (!%p152_p3), %v208_v9 }
   0xc   : > { %227 = vst [vmem:[#allocation2 + $0x60] sm:$0x1] (!%p152_p3), %v226_v10  ;;  %v282_v13 = vsel (!%p152_p3), %vm3716_vm4, 0, %v281_v12  ;;  %vm3736_vm7 = vmor (!%p152_p3), %vm199_vm1, %vm346_vm5  ;;  %v201_v61 = vld [vmem:[#allocation2] sm:$0x1] (!%p152_p3)  ;;  %vm1348_vm9 = vcmask (!%p152_p3), 1046528  }
   0xd   : > { %283 = vst [vmem:[#allocation2 + $0x68] sm:$0x1] (!%p152_p3), %v282_v13  ;;  %v257_v3 = vld [vmem:[#allocation2 + $0x8] sm:$0x1] (!%p152_p3)  ;;  %v284_v8 = vld [vmem:[#allocation2 + $0x74] sm:$0x1] (!%p152_p3) }
   0xe   : > { %s5071_s12 = smov (!%p180_p4, %s3638_s12), 1  ;;  %vm1090_vm10 = vsmask.f32 7424  ;;  %s3650_s21 = smov 8   ;;  %vm1025_vm11 = vcmask 31744   ;;  %vm1331_vm12 = vcmask 64544  }
   0xf   : > { %s3393_s16 = sshll.u32 %s5071_s12, 7  ;;  %s3651_s22 = smov 4   ;;  %vm1445_vm13 = vcmask 97344   ;;  %vm1638_vm14 = vcmask 130144   ;;  %vm1943_vm15 = vcmask 162944   ;;  %vm2777_vm0 = vcmask 1041408  }
  0x10   : > { %s3725_s19 = scalar_lea.vmem %s5054_s0, %s3393_s16  ;;  %v728_v34 = vld [vmem:[#allocation2 + $0x6c] sm:$0xf]  ;;  %s3652_s23 = smov 16   ;;  %vm2056_vm1 = vcmask 195744   ;;  %vm2250_vm3 = vcmask 228544   ;;  %vm2555_vm5 = vcmask 261344  }
  0x11   : > { %v330_v14 = vld [vmem:[%s3725_s19 + $0x40] sm:$0xf]  ;;  %v331_v15 = vld [vmem:[%s3725_s19 + $0x44] sm:$0xf]  ;;  %v332_v26 = vld [vmem:[%s3725_s19 + $0x48] sm:$0xf]  ;;  %s4950_s11 = scalar_lea.vmem %s5057_s3, %s3393_s16 }
  0x12   : > { %v314_v16 = vld [vmem:[%s3725_s19] sm:$0xf]  ;;  %v485_v17 = vshrl.u32 %v330_v14, 16  ;;  %v488_v18 = vshll.u32 %v330_v14, 16  ;;  %v493_v19 = vshrl.u32 %v331_v15, 16  ;;  %v496_v20 = vshll.u32 %v331_v15, 16 }
  0x13   : > { %v315_v21 = vld [vmem:[%s3725_s19 + $0x4] sm:$0xf]  ;;  %v349_v22 = vshrl.u32 %v314_v16, 16  ;;  %v352_v23 = vshll.u32 %v314_v16, 16  ;;  %v333_v30 = vld [vmem:[%s3725_s19 + $0x4c] sm:$0xf] }
  0x14   : > { %v357_v24 = vshrl.u32 %v315_v21, 16  ;;  %v360_v25 = vshll.u32 %v315_v21, 16  ;;  %v487_v28 = vrot.slane %v485_v17, 7  ;;  %v3740_v29 = vrot.slane %v493_v19, 7  ;;  %v671_v42 = vld [vmem:[#allocation2 + $0xc] sm:$0xf] }
  0x15   : > { %v502_v31 = vshrl.u32 %v332_v26, 16  ;;  %v505_v32 = vshll.u32 %v332_v26, 16  ;;  %v351_v35 = vrot.slane %v349_v22, 7  ;;  %v510_v37 = vshrl.u32 %v333_v30, 16  ;;  %v735_v44 = vld [vmem:[#allocation2 + $0x78] sm:$0xf] }
  0x16   : > { %v3749_v36 = vrot.slane %v357_v24, 7  ;;  %v513_v38 = vshll.u32 %v333_v30, 16  ;;  %v490_v39 = vor.u32 %v488_v18, %v487_v28  ;;  %v491_v40 = vrot.slane %v487_v28, 4  ;;  %v316_v49 = vld [vmem:[%s3725_s19 + $0x8] sm:$0xf]  ;;  %s3653_s24 = smov 20  }
  0x17   : > { %v498_v41 = vor.u32 %v496_v20, %v3740_v29  ;;  %v504_v43 = vrot.slane %v502_v31, 7  ;;  %v354_v45 = vor.u32 %v352_v23, %v351_v35  ;;  %v355_v46 = vrot.slane %v351_v35, 4  ;;  %v317_v50 = vld [vmem:[%s3725_s19 + $0xc] sm:$0xf]  ;;  %v328_v55 = vld [vmem:[%s3725_s19 + $0x38] sm:$0xf] }
  0x18   : > { %v362_v47 = vor.u32 %v360_v25, %v3749_v36  ;;  %v3753_v48 = vrot.slane %v510_v37, 7  ;;  %v729_v52 = vsel %vm3745_vm8, %v490_v39, %v728_v34  ;;  %v366_v59 = vshrl.u32 %v316_v49, 16  ;;  %v329_v60 = vld [vmem:[%s3725_s19 + $0x3c] sm:$0xf]  ;;  %v679_v10 = vld [vmem:[#allocation2 + $0x18] sm:$0xf] }
  0x19   : > { %v499_v51 = vsel %vm3736_vm7, %v491_v40, %v498_v41  ;;  %v507_v53 = vor.u32 %v505_v32, %v504_v43  ;;  %v508_v54 = vrot.slane %v504_v43, 4  ;;  %730 = vst [vmem:[#allocation2 + $0x6c] sm:$0xf] %v729_v52  ;;  %v672_v57 = vsel %vm3745_vm8, %v354_v45, %v671_v42  ;;  %v721_v18 = vld [vmem:[#allocation2 + $0x60] sm:$0xf]  ;;  %s3654_s25 = smov 24  }
  0x1a   : > { %731 = vst.msk [vmem:[#allocation2 + $0x70] sm:$0xf] %vm669_vm6, %v499_v51  ;;  %v363_v56 = vsel %vm3736_vm7, %v355_v46, %v362_v47  ;;  %v515_v58 = vor.u32 %v513_v38, %v3753_v48  ;;  %673 = vst [vmem:[#allocation2 + $0xc] sm:$0xf] %v672_v57  ;;  %v369_v63 = vshll.u32 %v316_v49, 16  ;;  %v374_v0 = vshrl.u32 %v317_v50, 16 }
  0x1b   : > { %675 = vst.msk [vmem:[#allocation2 + $0x10] sm:$0xf] %vm669_vm6, %v363_v56  ;;  %v736_v62 = vsel %vm3745_vm8, %v507_v53, %v735_v44  ;;  %v377_v2 = vshll.u32 %v317_v50, 16  ;;  %v368_v5 = vrot.slane %v366_v59, 7  ;;  %v468_v6 = vshrl.u32 %v328_v55, 16  ;;  %s3655_s26 = smov 28  }
  0x1c   : > { %v516_v4 = vsel %vm3736_vm7, %v508_v54, %v515_v58  ;;  %737 = vst [vmem:[#allocation2 + $0x78] sm:$0xf] %v736_v62  ;;  %v471_v7 = vshll.u32 %v328_v55, 16  ;;  %v3775_v9 = vrot.slane %v374_v0, 7  ;;  %v476_v12 = vshrl.u32 %v329_v60, 16  ;;  %s3656_s29 = smov 32  }
  0x1d   : > { %738 = vst.msk [vmem:[#allocation2 + $0x7c] sm:$0xf] %vm669_vm6, %v516_v4  ;;  %v479_v13 = vshll.u32 %v329_v60, 16  ;;  %v202_v14 = vsel %vm3697_vm2, 0, %v201_v61  ;;  %v371_v15 = vor.u32 %v369_v63, %v368_v5  ;;  %v372_v16 = vrot.slane %v368_v5, 4 }
  0x1e   : > { %v470_v17 = vrot.slane %v468_v6, 7  ;;  %203 = vst [vmem:[#allocation2] sm:$0x1] %v202_v14  ;;  %v258_v19 = vsel %vm3716_vm4, 0, %v257_v3  ;;  %v379_v20 = vor.u32 %v377_v2, %v3775_v9  ;;  %v478_v21 = vrot.slane %v476_v12, 7 }
  0x1f   : > { %259 = vst [vmem:[#allocation2 + $0x8] sm:$0x1] %v258_v19  ;;  %v285_v22 = vsel %vm3716_vm4, 0, %v284_v8  ;;  %v260_v23 = vld [vmem:[#allocation2 + $0x14] sm:$0x1]  ;;  %v680_v24 = vsel %vm3745_vm8, %v371_v15, %v679_v10  ;;  %v3648_v30 = vmov 0  }
  0x20   : > { %v473_v25 = vor.u32 %v471_v7, %v470_v17  ;;  %v474_v26 = vrot.slane %v470_v17, 4  ;;  %v725_v28 = vld [vmem:[#allocation2 + $0x68] sm:$0x1]  ;;  %791 = vst.msk [vmem:[#allocation2 + $0x4] sm:$0xf] %vm669_vm6, %v3648_v30  ;;  %v380_v32 = vsel %vm3736_vm7, %v372_v16, %v379_v20  ;;  %v481_v34 = vor.u32 %v479_v13, %v478_v21 }
  0x21   : > { %839 = vst.msk [vmem:[#allocation2 + $0xd0] sm:$0xf] %vm669_vm6, %v3648_v30  ;;  %286 = vst [vmem:[#allocation2 + $0x74] sm:$0x1] %v285_v22  ;;  %v3788_v31 = vld [vmem:[#allocation2 + $0x6c] sm:$0xff]   ;;  %v483_v35 = vrot.slane %v478_v21, 4 }
  0x22   : > { %681 = vst [vmem:[#allocation2 + $0x18] sm:$0xf] %v680_v24  ;;  %v3792_v37 = vld [vmem:[#allocation2 + $0xc] sm:$0xff]   ;;  %682 = vst.msk [vmem:[#allocation2 + $0x1c] sm:$0xf] %vm669_vm6, %v380_v32  ;;  %v722_v38 = vsel %vm3745_vm8, %v473_v25, %v721_v18  ;;  %v261_v39 = vsel %vm3716_vm4, 0, %v260_v23  ;;  %1606 = vrot.lane.b32.xlu1 %v3788_v31, %s3649_s20  ;;  %v482_v40 = vsel %vm3736_vm7, %v474_v26, %v481_v34 }
  0x23   : > { %723 = vst [vmem:[#allocation2 + $0x60] sm:$0xf] %v722_v38  ;;  %v726_v41 = vsel %vm3697_vm2, %v483_v35, %v725_v28  ;;  %262 = vst [vmem:[#allocation2 + $0x14] sm:$0x1] %v261_v39  ;;  %1590 = vrot.lane.b32.xlu0 %v3792_v37, %s3649_s20  ;;  %v500_v43 = vrot.slane %v3740_v29, 4  ;;  %v3811_v44 = vld [vmem:[#allocation2 + $0x6c] sm:$0xff]  }
  0x24   : > { %v3807_v42 = vld [vmem:[#allocation2 + $0x78] sm:$0xff]   ;;  %724 = vst.msk [vmem:[#allocation2 + $0x64] sm:$0xf] %vm669_vm6, %v482_v40  ;;  %727 = vst [vmem:[#allocation2 + $0x68] sm:$0x1] %v726_v41  ;;  %v3815_v49 = vld [vmem:[#allocation2 + $0xc] sm:$0xff]  }
  0x25   : > { %v788_v45 = vld [vmem:[#allocation2] sm:$0xf]  ;;  %v364_v52 = vrot.slane %v3749_v36, 4  ;;  %v1376_v55 = vrot.slane %v3811_v44, 1  ;;  %v1202_v56 = vshll.u32 %v3811_v44, 16  ;;  %v1106_v58 = vshll.u32 %v3815_v49, 16 }
  0x26   : > { %v789_v46 = vsel %vm3745_vm8, 0, %v788_v45  ;;  %v792_v47 = vld [vmem:[#allocation2 + $0x8] sm:$0x1]  ;;  %1608 = vrot.lane.b32.xlu1 %v3807_v42, %s3649_s20  ;;  %v263_v53 = vld [vmem:[#allocation2 + $0x20] sm:$0x1]  ;;  %v1802_v59 = vshll.u32 %v3788_v31, 16 }
  0x27   : > { %790 = vst [vmem:[#allocation2] sm:$0xf] %v789_v46  ;;  %v793_v50 = vsel %vm3697_vm2, 0, %v792_v47  ;;  %v1200_v61 = vshrl.u32 %v3811_v44, 16  ;;  %v1352_v63 = vrot.slane %v3815_v49, 1  ;;  %v1104_v0 = vshrl.u32 %v3815_v49, 16 }
  0x28   : > { %v732_v51 = vld [vmem:[#allocation2 + $0x74] sm:$0x1]  ;;  %794 = vst [vmem:[#allocation2 + $0x8] sm:$0x1] %v793_v50  ;;  %v264_v2 = vsel %vm3716_vm4, 0, %v263_v53  ;;  %v1204_v4 = vrot.slane %v1202_v56, 1 }
  0x29   : > { %v733_v29 = vsel %vm3697_vm2, %v500_v43, %v732_v51  ;;  %v3824_v54 = vld [vmem:[#allocation2 + $0x18] sm:$0xff]   ;;  %v1706_v5 = vshll.u32 %v3792_v37, 16  ;;  %v1800_v6 = vshrl.u32 %v3788_v31, 16  ;;  %265 = vst [vmem:[#allocation2 + $0x20] sm:$0x1] %v264_v2  ;;  %v1108_v10 = vrot.slane %v1106_v58, 1 }
  0x2a   : > { %734 = vst [vmem:[#allocation2 + $0x74] sm:$0x1] %v733_v29  ;;  %v676_v57 = vld [vmem:[#allocation2 + $0x14] sm:$0x1]  ;;  %1592 = vrot.lane.b32.xlu0 %v3824_v54, %s3649_s20  ;;  %v1804_v12 = vrot.slane %v1802_v59, 1  ;;  %v1718_v29 = vshll.u32 %v3824_v54, 16  ;;  %v1205_v56 = vor.u32 %v1204_v4, %v1200_v61 }
  0x2b   : > { %v3832_v36 = vld [vmem:[#allocation2 + $0x60] sm:$0xff]   ;;  %v677_v60 = vsel %vm3697_vm2, %v364_v52, %v676_v57  ;;  %v3530_v62 = vld [vmem:[#allocation2 + $0x68] ss:$0 sps:$4 sm:$0x11]   ;;  %v1109_v35 = vor.u32 %v1108_v10, %v1104_v0  ;;  %v381_v52 = vrot.slane %v3775_v9, 4  ;;  %v1704_v58 = vshrl.u32 %v3792_v37, 16 }
  0x2c   : > { %678 = vst [vmem:[#allocation2 + $0x14] sm:$0x1] %v677_v60  ;;  %v1373_v3 = vrot.slane %v3832_v36, 1  ;;  %v1374_v7 = vrot.slane %v3530_v62, 1  ;;  %v1190_v14 = vshll.u32 %v3832_v36, 16  ;;  %v1188_v23 = vshrl.u32 %v3832_v36, 16 }
  0x2d   : > { %v287_v32 = vld [vmem:[#allocation2 + $0x80] sm:$0x1]  ;;  %v1195_v39 = vshll.u32 %v3530_v62, 16  ;;  %v1708_v59 = vrot.slane %v1706_v5, 1  ;;  %v210_v2 = vld [vmem:[#allocation2 + $0x24] sm:$0x1] }
  0x2e   : > { %v3844_v8 = vld [vmem:[#allocation2] sm:$0xff]   ;;  %v1375_v15 = vsel %vm1348_vm9, %v1373_v3, %v1374_v7  ;;  %v1192_v38 = vrot.slane %v1190_v14, 1  ;;  %v288_v9 = vsel %vm3716_vm4, 0, %v287_v32  ;;  %v1805_v3 = vor.u32 %v1804_v12, %v1800_v6  ;;  %v318_v7 = vld [vmem:[%s3725_s19 + $0x10] sm:$0xf]  ;;  %1027 = vst.msk [vmem:[#allocation3 + $0x8] sm:$0xff] %vm1025_vm11, %v3815_v49 }
  0x2f   : > { %v3532_v13 = vld [vmem:[#allocation2 + $0x8] ss:$0 sps:$4 sm:$0x11]   ;;  %v1349_v16 = vrot.slane %v3844_v8, 1  ;;  %1413 = vrot.lane.b32.xlu1 %v1375_v15, %s3650_s21  ;;  %v1092_v19 = vshrl.u32 %v3844_v8, 16  ;;  %v1094_v20 = vshll.u32 %v3844_v8, 16 }
  0x30   : > { %v1350_v18 = vrot.slane %v3532_v13, 1  ;;  %v1099_v21 = vshll.u32 %v3532_v13, 16  ;;  %v683_v40 = vld [vmem:[#allocation2 + $0x20] sm:$0x1]  ;;  %v1193_v61 = vor.u32 %v1192_v38, %v1188_v23  ;;  %v1197_v0 = vrot.slane %v1195_v39, 1  ;;  %1026 = vst.msk [vmem:[#allocation3] sm:$0xff] %vm1025_vm11, %v3844_v8 }
  0x31   : > { %v3534_v17 = vld [vmem:[#allocation2 + $0x74] ss:$0 sps:$4 sm:$0x11]   ;;  %v1096_v30 = vrot.slane %v1094_v20, 1  ;;  %v684_v60 = vsel %vm3697_vm2, %v381_v52, %v683_v40  ;;  %289 = vst [vmem:[#allocation2 + $0x80] sm:$0x1] %v288_v9 }
  0x32   : > { %v1377_v22 = vrot.slane %v3534_v17, 1  ;;  %v1207_v24 = vshll.u32 %v3534_v17, 16  ;;  %v3853_v25 = vld [vmem:[#allocation2 + $0x74] ss:$0 sps:$4 sm:$0x11]   ;;  %v1351_v26 = vsel %vm1348_vm9, %v1349_v16, %v1350_v18  ;;  %v1101_v45 = vrot.slane %v1099_v21, 1 }
  0x33   : > { %v3536_v28 = vld [vmem:[#allocation2 + $0x14] ss:$0 sps:$4 sm:$0x11]   ;;  %1397 = vrot.lane.b32.xlu0 %v1351_v26, %s3650_s21  ;;  %v1097_v43 = vor.u32 %v1096_v30, %v1092_v19  ;;  %v1807_v51 = vshll.u32 %v3853_v25, 16  ;;  %685 = vst [vmem:[#allocation2 + $0x20] sm:$0x1] %v684_v60  ;;  %v1709_v17 = vor.u32 %v1708_v59, %v1704_v58  ;;  %v1198_v12 = vsel %vm1090_vm10, %v1193_v61, %v1197_v0 }
  0x34   : > { %v1378_v34 = vsel %vm1348_vm9, %v1376_v55, %v1377_v22  ;;  %v1353_v41 = vrot.slane %v3536_v28, 1  ;;  %v1111_v46 = vshll.u32 %v3536_v28, 16  ;;  %v3859_v47 = vld [vmem:[#allocation2 + $0x14] ss:$0 sps:$4 sm:$0x11]   ;;  %v1209_v50 = vrot.slane %v1207_v24, 1 }
  0x35   : > { %1415 = vrot.lane.b32.xlu1 %v1378_v34, %s3650_s21  ;;  %v1711_v57 = vshll.u32 %v3859_v47, 16  ;;  %v1102_v62 = vsel %vm1090_vm10, %v1097_v43, %v1101_v45  ;;  %v1809_v4 = vrot.slane %v1807_v51, 1  ;;  %v1716_v5 = vshrl.u32 %v3824_v54, 16  ;;  %v319_v15 = vld [vmem:[%s3725_s19 + $0x14] sm:$0xf]  ;;  %1034 = vst.msk [vmem:[#allocation3 + $0x40] sm:$0xff] %vm1025_vm11, %v3832_v36 }
  0x36   : > { %v1354_v53 = vsel %vm1348_vm9, %v1352_v63, %v1353_v41  ;;  %v1113_v55 = vrot.slane %v1111_v46, 1  ;;  %v1210_v10 = vsel %vm1090_vm10, %v1205_v56, %v1209_v50  ;;  %v1720_v14 = vrot.slane %v1718_v29, 1  ;;  %v234_v16 = vld [vmem:[#allocation2 + $0x84] sm:$0x1]  ;;  %v334_v20 = vld [vmem:[%s3725_s19 + $0x50] sm:$0xf] }
  0x37   : > { %1399 = vrot.lane.b32.xlu0 %v1354_v53, %s3650_s21  ;;  %v1713_v13 = vrot.slane %v1711_v57, 1  ;;  %v517_v18 = vrot.slane %v3753_v48, 4  ;;  %v211_v19 = vsel %vm3697_vm2, 0, %v210_v2  ;;  %v335_v6 = vld [vmem:[%s3725_s19 + $0x54] sm:$0xf]  ;;  %v383_v21 = vshrl.u32 %v318_v7, 16 }
  0x38   : > { %v1114_v63 = vsel %vm1090_vm10, %v1109_v35, %v1113_v55  ;;  %212 = vst [vmem:[#allocation2 + $0x24] sm:$0x1] %v211_v19  ;;  %v386_v22 = vshll.u32 %v318_v7, 16  ;;  %v1810_v23 = vsel %vm1090_vm10, %v1805_v3, %v1809_v4  ;;  %v391_v24 = vshrl.u32 %v319_v15, 16  ;;  %v739_v40 = vld [vmem:[#allocation2 + $0x80] sm:$0x1] }
  0x39   : > { %1285 = vrot.lane.b32.xlu1 %v1114_v63, %s3651_s22  ;;  %v394_v26 = vshll.u32 %v319_v15, 16  ;;  %v235_v28 = vsel %vm3697_vm2, 0, %v234_v16  ;;  %v385_v48 = vrot.slane %v383_v21, 7  ;;  %v519_v30 = vshrl.u32 %v334_v20, 16  ;;  %v266_v57 = vld [vmem:[#allocation2 + $0x2c] sm:$0x1] }
  0x3a   : > { %236 = vst [vmem:[#allocation2 + $0x84] sm:$0x1] %v235_v28  ;;  %v522_v32 = vshll.u32 %v334_v20, 16  ;;  %v527_v34 = vshrl.u32 %v335_v6, 16  ;;  %v1714_v35 = vsel %vm1090_vm10, %v1709_v17, %v1713_v13  ;;  %v3892_v39 = vrot.slane %v391_v24, 7  ;;  %v3919_v13 = vld [vmem:[#allocation2 + $0x18] sm:$0xff]  }
  0x3b   : > { %1283 = vrot.lane.b32.xlu0 %v1102_v62, %s3651_s22  ;;  %v3539_v38 = vld [vmem:[#allocation2 + $0x20] ss:$0 sps:$4 sm:$0x11]   ;;  %v388_v41 = vor.u32 %v386_v22, %v385_v48  ;;  %v389_v43 = vrot.slane %v385_v48, 4  ;;  %v521_v45 = vrot.slane %v519_v30, 7  ;;  %v1721_v50 = vor.u32 %v1720_v14, %v1716_v5  ;;  %v3930_v21 = vld [vmem:[#allocation2 + $0x78] sm:$0xff]  }
  0x3c   : > { %v3894_v46 = vrot.slane %v527_v34, 7  ;;  %v1723_v51 = vshll.u32 %v3539_v38, 16  ;;  %v740_v52 = vsel %vm3697_vm2, %v517_v18, %v739_v40  ;;  %v396_v29 = vor.u32 %v394_v26, %v3892_v39  ;;  %v290_v2 = vld [vmem:[#allocation2 + $0x8c] sm:$0x1]  ;;  %v3938_v28 = vld [vmem:[#allocation2 + $0x18] sm:$0xff]   ;;  %1035 = vst.msk [vmem:[#allocation3 + $0x48] sm:$0xff] %vm1025_vm11, %v3811_v44 }
  0x3d   : > { %1301 = vrot.lane.b32.xlu1 %v1210_v10, %s3651_s22  ;;  %741 = vst [vmem:[#allocation2 + $0x80] sm:$0x1] %v740_v52  ;;  %v524_v53 = vor.u32 %v522_v32, %v521_v45  ;;  %v525_v55 = vrot.slane %v521_v45, 4  ;;  %v530_v56 = vshll.u32 %v335_v6, 16  ;;  %v1814_v59 = vshll.u32 %v3807_v42, 16  ;;  %1028 = vst.msk [vmem:[#allocation3 + $0x10] sm:$0xff] %vm1025_vm11, %v3938_v28 }
  0x3e   : > { %v1725_v58 = vrot.slane %v1723_v51, 1  ;;  %v397_v60 = vsel %vm3736_vm7, %v389_v43, %v396_v29  ;;  %v1960_v62 = vrot.slane %v3792_v37, 1  ;;  %v1961_v63 = vrot.slane %v3859_v47, 1  ;;  %v3926_v19 = vld [vmem:[#allocation2 + $0x20] ss:$0 sps:$4 sm:$0x11]  }
  0x3f   : > { %1299 = vrot.lane.b32.xlu0 %v1198_v12, %s3651_s22  ;;  %v686_v9 = vld [vmem:[#allocation2 + $0x24] sm:$0xf]  ;;  %689 = vst.msk [vmem:[#allocation2 + $0x28] sm:$0xf] %vm669_vm6, %v397_v60  ;;  %v532_v0 = vor.u32 %v530_v56, %v3894_v46  ;;  %v267_v5 = vsel %vm3716_vm4, 0, %v266_v57  ;;  %v1812_v7 = vshrl.u32 %v3807_v42, 16 }
  0x40   : > { %v687_v61 = vsel %vm3745_vm8, %v388_v41, %v686_v9  ;;  %v1726_v3 = vsel %vm1090_vm10, %v1721_v50, %v1725_v58  ;;  %268 = vst [vmem:[#allocation2 + $0x2c] sm:$0x1] %v267_v5  ;;  %v1816_v10 = vrot.slane %v1814_v59, 1  ;;  %v291_v14 = vsel %vm3716_vm4, 0, %v290_v2  ;;  %v3957_v29 = vld [vmem:[#allocation2 + $0x78] sm:$0xff]  }
  0x41   : > { %1911 = vrot.lane.b32.xlu1 %v1810_v23, %s3652_s23  ;;  %688 = vst [vmem:[#allocation2 + $0x24] sm:$0xf] %v687_v61  ;;  %v742_v4 = vld [vmem:[#allocation2 + $0x84] sm:$0xf]  ;;  %v533_v37 = vsel %vm3736_vm7, %v525_v55, %v532_v0  ;;  %v1962_v15 = vsel %vm1348_vm9, %v1960_v62, %v1961_v63  ;;  %v1963_v16 = vrot.slane %v3824_v54, 1  ;;  %v1964_v17 = vrot.slane %v3539_v38, 1 }
  0x42   : > { %v743_v47 = vsel %vm3745_vm8, %v524_v53, %v742_v4  ;;  %745 = vst.msk [vmem:[#allocation2 + $0x88] sm:$0xf] %vm669_vm6, %v533_v37  ;;  %292 = vst [vmem:[#allocation2 + $0x8c] sm:$0x1] %v291_v14  ;;  %v398_v20 = vrot.slane %v3892_v39, 4  ;;  %v1817_v6 = vor.u32 %v1816_v10, %v1812_v7  ;;  %v2318_v22 = vshll.u32 %v3919_v13, 16 }
  0x43   : > { %1895 = vrot.lane.b32.xlu0 %v1714_v35, %s3652_s23  ;;  %744 = vst [vmem:[#allocation2 + $0x84] sm:$0xf] %v743_v47  ;;  %v1984_v23 = vrot.slane %v3788_v31, 1  ;;  %v1965_v54 = vsel %vm1348_vm9, %v1963_v16, %v1964_v17  ;;  %v534_v26 = vrot.slane %v3894_v46, 4  ;;  %v1985_v30 = vrot.slane %v3853_v25, 1  ;;  %1036 = vst.msk [vmem:[#allocation3 + $0x50] sm:$0xff] %vm1025_vm11, %v3957_v29 }
  0x44   : > { %v3540_v18 = vld [vmem:[#allocation2 + $0x80] ss:$0 sps:$4 sm:$0x11]   ;;  %v2316_v34 = vshrl.u32 %v3919_v13, 16  ;;  %v2323_v35 = vshll.u32 %v3926_v19, 16  ;;  %v2320_v39 = vrot.slane %v2318_v22, 1 }
  0x45   : > { %v1819_v12 = vshll.u32 %v3540_v18, 16  ;;  %v2414_v40 = vshll.u32 %v3930_v21, 16  ;;  %v3952_v45 = vld [vmem:[#allocation2 + $0x20] ss:$0 sps:$4 sm:$0x11]   ;;  %v1986_v46 = vsel %vm1348_vm9, %v1984_v23, %v1985_v30  ;;  %v1987_v50 = vrot.slane %v3807_v42, 1 }
  0x46   : > { %v1988_v51 = vrot.slane %v3540_v18, 1  ;;  %v1118_v52 = vshll.u32 %v3938_v28, 16  ;;  %v3959_v53 = vld [vmem:[#allocation2 + $0x80] ss:$0 sps:$4 sm:$0x11]   ;;  %v2412_v55 = vshrl.u32 %v3930_v21, 16  ;;  %v2321_v57 = vor.u32 %v2320_v39, %v2316_v34 }
  0x47   : > { %1897 = vrot.lane.b32.xlu0 %v1726_v3, %s3652_s23  ;;  %v1821_v48 = vrot.slane %v1819_v12, 1  ;;  %v690_v32 = vld [vmem:[#allocation2 + $0x2c] sm:$0x1]  ;;  %v2325_v58 = vrot.slane %v2323_v35, 1  ;;  %v2416_v59 = vrot.slane %v2414_v40, 1  ;;  %v2572_v42 = vrot.slane %v3919_v13, 1 }
  0x48   : > { %v3935_v24 = vld [vmem:[#allocation2 + $0x24] sm:$0xff]   ;;  %v691_v38 = vsel %vm3697_vm2, %v398_v20, %v690_v32  ;;  %v2573_v62 = vrot.slane %v3926_v19, 1  ;;  %v2596_v63 = vrot.slane %v3930_v21, 1  ;;  %v1989_v61 = vsel %vm1348_vm9, %v1987_v50, %v1988_v51  ;;  %v3986_v16 = vld [vmem:[#allocation2 + $0x80] ss:$0 sps:$4 sm:$0x11]  }
  0x49   : > { %v1822_v31 = vsel %vm1090_vm10, %v1817_v6, %v1821_v48  ;;  %692 = vst [vmem:[#allocation2 + $0x2c] sm:$0x1] %v691_v38  ;;  %v746_v41 = vld [vmem:[#allocation2 + $0x8c] sm:$0x1]  ;;  %v2330_v25 = vshll.u32 %v3935_v24, 16  ;;  %v2328_v60 = vshrl.u32 %v3935_v24, 16  ;;  %v2417_v19 = vor.u32 %v2416_v59, %v2412_v55 }
  0x4a   : > { %1913 = vrot.lane.b32.xlu1 %v1822_v31, %s3652_s23  ;;  %v747_v43 = vsel %vm3697_vm2, %v534_v26, %v746_v41  ;;  %v3964_v56 = vld [vmem:[#allocation2 + $0x84] sm:$0xff]   ;;  %v1116_v0 = vshrl.u32 %v3938_v28, 16  ;;  %v1120_v2 = vrot.slane %v1118_v52, 1  ;;  %v1123_v3 = vshll.u32 %v3952_v45, 16  ;;  %v213_v17 = vld [vmem:[#allocation2 + $0x30] sm:$0x1] }
  0x4b   : > { %2008 = vrot.lane.b32.xlu0 %v1962_v15, %s3653_s24  ;;  %748 = vst [vmem:[#allocation2 + $0x8c] sm:$0x1] %v747_v43  ;;  %v2332_v9 = vrot.slane %v2330_v25, 1  ;;  %v2419_v4 = vshll.u32 %v3959_v53, 16  ;;  %v2426_v37 = vshll.u32 %v3964_v56, 16  ;;  %v2597_v47 = vrot.slane %v3959_v53, 1 }
  0x4c   : > { %v1212_v7 = vshrl.u32 %v3957_v29, 16  ;;  %v1214_v10 = vshll.u32 %v3957_v29, 16  ;;  %v320_v18 = vld [vmem:[%s3725_s19 + $0x18] sm:$0xf]  ;;  %v1125_v6 = vrot.slane %v1123_v3, 1  ;;  %v1121_v26 = vor.u32 %v1120_v2, %v1116_v0  ;;  %v3997_v34 = vld [vmem:[#allocation2 + $0x24] sm:$0xff]  }
  0x4d   : > { %v2333_v14 = vor.u32 %v2332_v9, %v2328_v60  ;;  %v321_v12 = vld [vmem:[%s3725_s19 + $0x1c] sm:$0xf]  ;;  %v2421_v22 = vrot.slane %v2419_v4, 1  ;;  %v237_v48 = vld [vmem:[#allocation2 + $0x90] sm:$0x1]  ;;  %v2574_v30 = vsel %vm1348_vm9, %v2572_v42, %v2573_v62  ;;  %v2428_v38 = vrot.slane %v2426_v37, 1 }
  0x4e   : > { %2024 = vrot.lane.b32.xlu1 %v1986_v46, %s3653_s24  ;;  %v3995_v32 = vrot.slane %v1214_v10, 1  ;;  %v2575_v31 = vrot.slane %v3935_v24, 1  ;;  %v2599_v39 = vrot.slane %v3964_v56, 1  ;;  %v1219_v41 = vshll.u32 %v3986_v16, 16  ;;  %v336_v46 = vld [vmem:[%s3725_s19 + $0x58] sm:$0xf] }
  0x4f   : > { %2010 = vrot.lane.b32.xlu0 %v1965_v54, %s3653_s24  ;;  %v2424_v54 = vshrl.u32 %v3964_v56, 16  ;;  %v214_v25 = vsel %vm3697_vm2, 0, %v213_v17  ;;  %v400_v43 = vshrl.u32 %v320_v18, 16  ;;  %v2422_v50 = vsel %vm1090_vm10, %v2417_v19, %v2421_v22  ;;  %v4014_v59 = vld [vmem:[#allocation2 + $0x84] sm:$0xff]   ;;  %1029 = vst.msk [vmem:[#allocation3 + $0x18] sm:$0xff] %vm1025_vm11, %v3997_v34 }
  0x50   : > { %v3975_v5 = vld [vmem:[#allocation2 + $0x2c] ss:$0 sps:$4 sm:$0x11]   ;;  %v1126_v51 = vsel %vm1090_vm10, %v1121_v26, %v1125_v6  ;;  %215 = vst [vmem:[#allocation2 + $0x30] sm:$0x1] %v214_v25  ;;  %v403_v52 = vshll.u32 %v320_v18, 16  ;;  %v1217_v53 = vor.u32 %v3995_v32, %v1212_v7 }
  0x51   : > { %v2335_v15 = vshll.u32 %v3975_v5, 16  ;;  %v408_v55 = vshrl.u32 %v321_v12, 16  ;;  %v402_v42 = vrot.slane %v400_v43, 7  ;;  %v411_v60 = vshll.u32 %v321_v12, 16  ;;  %1037 = vst.msk [vmem:[#allocation3 + $0x58] sm:$0xff] %vm1025_vm11, %v4014_v59 }
  0x52   : > { %2026 = vrot.lane.b32.xlu1 %v1989_v61, %s3653_s24  ;;  %v3989_v20 = vld [vmem:[#allocation2 + $0x8c] ss:$0 sps:$4 sm:$0x11]   ;;  %v238_v9 = vsel %vm3697_vm2, 0, %v237_v48  ;;  %v2429_v62 = vor.u32 %v2428_v38, %v2424_v54  ;;  %v536_v2 = vshrl.u32 %v336_v46, 16  ;;  %v539_v3 = vshll.u32 %v336_v46, 16 }
  0x53   : > { %2202 = vrot.lane.b32.xlu0 %v3919_v13, %s3654_s25  ;;  %v2326_v13 = vsel %vm1090_vm10, %v2321_v57, %v2325_v58  ;;  %v2337_v23 = vrot.slane %v2335_v15, 1  ;;  %v2431_v40 = vshll.u32 %v3989_v20, 16  ;;  %v337_v57 = vld [vmem:[%s3725_s19 + $0x5c] sm:$0xf]  ;;  %v1130_v58 = vshll.u32 %v3997_v34, 16  ;;  %v3596_v46 = vld [vmem:[%s5055_s1 + $0x8] sm:$0xff]  }
  0x54   : > { %v4020_v61 = vld [vmem:[#allocation2 + $0x2c] ss:$0 sps:$4 sm:$0x11]   ;;  %v4022_v0 = vrot.slane %v408_v55, 7  ;;  %239 = vst [vmem:[#allocation2 + $0x90] sm:$0x1] %v238_v9  ;;  %v405_v17 = vor.u32 %v403_v52, %v402_v42 }
  0x55   : > { %v2338_v35 = vsel %vm1090_vm10, %v2333_v14, %v2337_v23  ;;  %v2433_v4 = vrot.slane %v2431_v40, 1  ;;  %v406_v37 = vrot.slane %v402_v42, 4  ;;  %v544_v10 = vshrl.u32 %v337_v57, 16  ;;  %v3593_v14 = vld [vmem:[%s5055_s1] sm:$0xff]   ;;  %v269_v54 = vld [vmem:[#allocation2 + $0x38] sm:$0x1] }
  0x56   : > { %2218 = vrot.lane.b32.xlu1 %v3930_v21, %s3654_s25  ;;  %v1128_v15 = vshrl.u32 %v3997_v34, 16  ;;  %v413_v18 = vor.u32 %v411_v60, %v4022_v0  ;;  %v538_v19 = vrot.slane %v536_v2, 7  ;;  %v2576_v6 = vrot.slane %v3975_v5, 1  ;;  %3446 = vmatprep.subr.bf16.mxu0 %v3593_v14  ;;  %v4039_v40 = vld [vmem:[#allocation2 + $0x8c] ss:$0 sps:$4 sm:$0x11]  }
  0x57   : > { %2204 = vrot.lane.b32.xlu0 %v3935_v24, %s3654_s25  ;;  %v1132_v12 = vrot.slane %v1130_v58, 1  ;;  %v1226_v22 = vshll.u32 %v4014_v59, 16  ;;  %v4032_v23 = vrot.slane %v544_v10, 7  ;;  %v1135_v26 = vshll.u32 %v4020_v61, 16  ;;  %3484 = vmatprep.subr.bf16.mxu1 %v3593_v14  ;;  %v693_v25 = vld [vmem:[#allocation2 + $0x30] sm:$0xf] }
  0x58   : > { %v414_v48 = vsel %vm3736_vm7, %v406_v37, %v413_v18  ;;  %v542_v38 = vrot.slane %v538_v19, 4  ;;  %v2434_v5 = vsel %vm1090_vm10, %v2429_v62, %v2433_v4  ;;  %3447 = vmatpush3.bf16.msra.mxu0 %v3593_v14  ;;  %3487 = vmatpush3.bf16.msra.mxu1 %v3593_v14  ;;  %v1355_v52 = vrot.slane %v3938_v28, 1  ;;  %v216_v58 = vld [vmem:[#allocation2 + $0x3c] sm:$0x1]  ;;  %v4057_v42 = vld [vmem:[%s3725_s19 + $0x20] sm:$0xf] }
  0x59   : > { %696 = vst.msk [vmem:[#allocation2 + $0x34] sm:$0xf] %vm669_vm6, %v414_v48  ;;  %v694_v55 = vsel %vm3745_vm8, %v405_v17, %v693_v25  ;;  %v1221_v21 = vrot.slane %v1219_v41, 1  ;;  %v323_v9 = vld [vmem:[%s3725_s19 + $0x24] sm:$0xf]  ;;  %3448 = vmatprep.subr.bf16.mxu0 %v3596_v46  ;;  %v2577_v7 = vsel %vm1348_vm9, %v2575_v31, %v2576_v6  ;;  %v1133_v32 = vor.u32 %v1132_v12, %v1128_v15 }
  0x5a   : > { %2220 = vrot.lane.b32.xlu1 %v3964_v56, %s3654_s25  ;;  %695 = vst [vmem:[#allocation2 + $0x30] sm:$0xf] %v694_v55  ;;  %v240_v62 = vld [vmem:[#allocation2 + $0x9c] sm:$0x1]  ;;  %3485 = vmatprep.subr.bf16.mxu1 %v3596_v46  ;;  %v1224_v2 = vshrl.u32 %v4014_v59, 16  ;;  %v1231_v4 = vshll.u32 %v4039_v40, 16 }
  0x5b   : > { %2507 = vrot.lane.b32.xlu0 %v2326_v13, %s3655_s26  ;;  %v547_v13 = vshll.u32 %v337_v57, 16  ;;  %v270_v57 = vsel %vm3716_vm4, 0, %v269_v54  ;;  %v1356_v24 = vrot.slane %v3952_v45, 1  ;;  %v415_v31 = vrot.slane %v4022_v0, 4  ;;  %v338_v14 = vld [vmem:[%s3725_s19 + $0x60] sm:$0xf] }
  0x5c   : > { %271 = vst [vmem:[#allocation2 + $0x38] sm:$0x1] %v270_v57  ;;  %3449 = vmatpush3.bf16.msra.mxu0 %v3596_v46  ;;  %3488 = vmatpush3.bf16.msra.mxu1 %v3596_v46  ;;  %v217_v37 = vsel %vm3697_vm2, 0, %v216_v58  ;;  %v417_v10 = vshrl.u32 %v4057_v42, 16  ;;  %v551_v15 = vrot.slane %v4032_v23, 4  ;;  %v420_v17 = vshll.u32 %v4057_v42, 16 }
  0x5d   : > { %v549_v43 = vor.u32 %v547_v13, %v4032_v23  ;;  %v425_v13 = vshrl.u32 %v323_v9, 16  ;;  %218 = vst [vmem:[#allocation2 + $0x3c] sm:$0x1] %v217_v37  ;;  %v428_v45 = vshll.u32 %v323_v9, 16  ;;  %v241_v18 = vsel %vm3697_vm2, 0, %v240_v62  ;;  %v4094_v12 = vld [vmem:[#allocation2 + $0x24] sm:$0xff]  }
  0x5e   : > { %2523 = vrot.lane.b32.xlu1 %v2422_v50, %s3655_s26  ;;  %v2598_v50 = vsel %vm1348_vm9, %v2596_v63, %v2597_v47  ;;  %v749_v47 = vld [vmem:[#allocation2 + $0x90] sm:$0xf]  ;;  %v1222_v0 = vsel %vm1090_vm10, %v1217_v53, %v1221_v21  ;;  %242 = vst [vmem:[#allocation2 + $0x9c] sm:$0x1] %v241_v18  ;;  %v2600_v23 = vrot.slane %v3989_v20, 1  ;;  %v553_v48 = vshrl.u32 %v338_v14, 16 }
  0x5f   : > { %2509 = vrot.lane.b32.xlu0 %v2338_v35, %s3655_s26  ;;  %v541_v35 = vor.u32 %v539_v3, %v538_v19  ;;  %v550_v63 = vsel %vm3736_vm7, %v542_v38, %v549_v43  ;;  %v1228_v3 = vrot.slane %v1226_v22, 1  ;;  %v339_v19 = vld [vmem:[%s3725_s19 + $0x64] sm:$0xf]  ;;  %v419_v22 = vrot.slane %v417_v10, 7 }
  0x60   : > { %752 = vst.msk [vmem:[#allocation2 + $0x94] sm:$0xf] %vm669_vm6, %v550_v63  ;;  %v4096_v54 = vrot.slane %v425_v13, 7  ;;  %v561_v25 = vshrl.u32 %v339_v19, 16  ;;  %v1357_v46 = vsel %vm1348_vm9, %v1355_v52, %v1356_v24  ;;  %v1233_v20 = vrot.slane %v1231_v4, 1  ;;  %v4133_v37 = vld [vmem:[#allocation2 + $0x84] sm:$0xff]  }
  0x61   : > { %v750_v41 = vsel %vm3745_vm8, %v541_v35, %v749_v47  ;;  %v556_v35 = vshll.u32 %v338_v14, 16  ;;  %v1229_v43 = vor.u32 %v1228_v3, %v1224_v2  ;;  %v1359_v57 = vrot.slane %v4020_v61, 1  ;;  %v4114_v47 = vld [vmem:[#allocation2 + $0x2c] ss:$0 sps:$4 sm:$0x11]   ;;  %v4124_v62 = vld [vmem:[#allocation2 + $0x30] sm:$0xff]  }
  0x62   : > { %2525 = vrot.lane.b32.xlu1 %v2434_v5, %s3655_s26  ;;  %751 = vst [vmem:[#allocation2 + $0x90] sm:$0xf] %v750_v41  ;;  %v430_v5 = vor.u32 %v428_v45, %v4096_v54  ;;  %v422_v42 = vor.u32 %v420_v17, %v419_v22  ;;  %v2601_v53 = vsel %vm1348_vm9, %v2599_v39, %v2600_v23  ;;  %v555_v21 = vrot.slane %v553_v48, 7  ;;  %v272_v61 = vld [vmem:[#allocation2 + $0x44] sm:$0x1] }
  0x63   : > { %2620 = vrot.lane.b32.xlu0 %v2574_v30, %s3656_s29  ;;  %v293_v30 = vld [vmem:[#allocation2 + $0x98] sm:$0x1]  ;;  %v564_v63 = vshll.u32 %v339_v19, 16  ;;  %v1234_v3 = vsel %vm1090_vm10, %v1229_v43, %v1233_v20  ;;  %v1380_v4 = vrot.slane %v3986_v16, 1  ;;  %v1728_v10 = vshrl.u32 %v4094_v12, 16 }
  0x64   : > { %v294_v60 = vsel %vm3716_vm4, 0, %v293_v30  ;;  %v697_v38 = vld [vmem:[#allocation2 + $0x38] sm:$0x1]  ;;  %v423_v30 = vrot.slane %v419_v22, 4  ;;  %v700_v9 = vld [vmem:[#allocation2 + $0x3c] sm:$0xf] }
  0x65   : > { %295 = vst [vmem:[#allocation2 + $0x98] sm:$0x1] %v294_v60  ;;  %v1730_v60 = vshll.u32 %v4094_v12, 16  ;;  %v559_v56 = vrot.slane %v555_v21, 4  ;;  %v756_v39 = vld [vmem:[#allocation2 + $0x9c] sm:$0xf]  ;;  %v701_v2 = vsel %vm3745_vm8, %v422_v42, %v700_v9 }
  0x66   : > { %2636 = vrot.lane.b32.xlu1 %v2598_v50, %s3656_s29  ;;  %v698_v50 = vsel %vm3697_vm2, %v415_v31, %v697_v38  ;;  %v431_v52 = vsel %vm3736_vm7, %v423_v30, %v430_v5  ;;  %702 = vst [vmem:[#allocation2 + $0x3c] sm:$0xf] %v701_v2  ;;  %v273_v13 = vsel %vm3716_vm4, 0, %v272_v61  ;;  %v4140_v16 = vld [vmem:[#allocation2 + $0x8c] ss:$0 sps:$4 sm:$0x11]  }
  0x67   : > { %1287 = vrot.lane.b32.xlu0 %v1126_v51, %s3651_s22  ;;  %v1137_v51 = vrot.slane %v1135_v26, 1  ;;  %v1358_v26 = vrot.slane %v3997_v34, 1  ;;  %699 = vst [vmem:[#allocation2 + $0x38] sm:$0x1] %v698_v50  ;;  %703 = vst.msk [vmem:[#allocation2 + $0x40] sm:$0xf] %vm669_vm6, %v431_v52 }
  0x68   : > { %v1732_v14 = vrot.slane %v1730_v60, 1  ;;  %274 = vst [vmem:[#allocation2 + $0x44] sm:$0x1] %v273_v13  ;;  %v296_v45 = vld [vmem:[#allocation2 + $0xa4] sm:$0x1]  ;;  %v1742_v19 = vshll.u32 %v4124_v62, 16 }
  0x69   : > { %v1138_v6 = vsel %vm1090_vm10, %v1133_v32, %v1137_v51  ;;  %v4119_v32 = vrot.slane %v561_v25, 7  ;;  %v1379_v51 = vrot.slane %v3957_v29, 1  ;;  %v1360_v41 = vsel %vm1348_vm9, %v1358_v26, %v1359_v57  ;;  %v4162_v43 = vld [vmem:[#allocation2 + $0x90] sm:$0xff]  }
  0x6a   : > { %1303 = vrot.lane.b32.xlu1 %v1222_v0, %s3651_s22  ;;  %v1383_v22 = vrot.slane %v4039_v40, 1  ;;  %v297_v23 = vsel %vm3716_vm4, 0, %v296_v45  ;;  %v1826_v48 = vshll.u32 %v4133_v37, 16  ;;  %v1733_v38 = vor.u32 %v1732_v14, %v1728_v10  ;;  %v4165_v50 = vld [vmem:[#allocation2 + $0x30] sm:$0xff]  }
  0x6b   : > { %2622 = vrot.lane.b32.xlu0 %v2577_v7, %s3656_s29  ;;  %v558_v7 = vor.u32 %v556_v35, %v555_v21  ;;  %v566_v24 = vor.u32 %v564_v63, %v4119_v32  ;;  %v1381_v0 = vsel %vm1348_vm9, %v1379_v51, %v1380_v4  ;;  %v432_v35 = vrot.slane %v4096_v54, 4  ;;  %298 = vst [vmem:[#allocation2 + $0xa4] sm:$0x1] %v297_v23  ;;  %v4178_v61 = vld [vmem:[#allocation2 + $0x30] sm:$0xff]  }
  0x6c   : > { %v753_v55 = vld [vmem:[#allocation2 + $0x98] sm:$0x1]  ;;  %v1740_v30 = vshrl.u32 %v4124_v62, 16  ;;  %v1744_v5 = vrot.slane %v1742_v19, 1  ;;  %v1824_v54 = vshrl.u32 %v4133_v37, 16  ;;  %v568_v57 = vrot.slane %v4119_v32, 4 }
  0x6d   : > { %v754_v58 = vsel %vm3697_vm2, %v551_v15, %v753_v55  ;;  %v757_v31 = vsel %vm3745_vm8, %v558_v7, %v756_v39  ;;  %v1735_v15 = vshll.u32 %v4114_v47, 16  ;;  %v567_v17 = vsel %vm3736_vm7, %v559_v56, %v566_v24  ;;  %v4181_v56 = vld [vmem:[#allocation2 + $0x90] sm:$0xff]   ;;  %1030 = vst.msk [vmem:[#allocation3 + $0x20] sm:$0xff] %vm1025_vm11, %v4178_v61 }
  0x6e   : > { %755 = vst [vmem:[#allocation2 + $0x98] sm:$0x1] %v754_v58  ;;  %2638 = vrot.lane.b32.xlu1 %v2601_v53, %s3656_s29  ;;  %758 = vst [vmem:[#allocation2 + $0x9c] sm:$0xf] %v757_v31  ;;  %v1828_v42 = vrot.slane %v1826_v48, 1  ;;  %v1745_v53 = vor.u32 %v1744_v5, %v1740_v30  ;;  %v1838_v60 = vshll.u32 %v4162_v43, 16 }
  0x6f   : > { %1289 = vrot.lane.b32.xlu0 %v1138_v6, %s3651_s22  ;;  %v4145_v18 = vld [vmem:[#allocation2 + $0x38] ss:$0 sps:$4 sm:$0x11]   ;;  %759 = vst.msk [vmem:[#allocation2 + $0xa0] sm:$0xf] %vm669_vm6, %v567_v17  ;;  %v1382_v6 = vrot.slane %v4014_v59, 1 }
  0x70   : > { %v1737_v26 = vrot.slane %v1735_v15, 1  ;;  %v1747_v40 = vshll.u32 %v4145_v18, 16  ;;  %v704_v55 = vld [vmem:[#allocation2 + $0x44] sm:$0x1]  ;;  %v2342_v9 = vshll.u32 %v4165_v50, 16  ;;  %v1966_v32 = vrot.slane %v4094_v12, 1 }
  0x71   : > { %v1384_v25 = vsel %vm1348_vm9, %v1382_v6, %v1383_v22  ;;  %v705_v20 = vsel %vm3697_vm2, %v432_v35, %v704_v55  ;;  %v4185_v39 = vld [vmem:[#allocation2 + $0x38] ss:$0 sps:$4 sm:$0x11]   ;;  %v1836_v4 = vshrl.u32 %v4162_v43, 16  ;;  %v1967_v24 = vrot.slane %v4114_v47, 1  ;;  %v4198_v31 = vld [vmem:[#allocation2 + $0x3c] sm:$0xff]  }
  0x72   : > { %1305 = vrot.lane.b32.xlu1 %v1234_v3, %s3651_s22  ;;  %v1738_v58 = vsel %vm1090_vm10, %v1733_v38, %v1737_v26  ;;  %v1749_v52 = vrot.slane %v1747_v40, 1  ;;  %706 = vst [vmem:[#allocation2 + $0x44] sm:$0x1] %v705_v20  ;;  %v760_v7 = vld [vmem:[#allocation2 + $0xa4] sm:$0x1]  ;;  %v1840_v10 = vrot.slane %v1838_v60, 1 }
  0x73   : > { %1401 = vrot.lane.b32.xlu0 %v1357_v46, %s3650_s21  ;;  %v1831_v46 = vshll.u32 %v4140_v16, 16  ;;  %v761_v51 = vsel %vm3697_vm2, %v568_v57, %v760_v7  ;;  %1038 = vst.msk [vmem:[#allocation3 + $0x60] sm:$0xff] %vm1025_vm11, %v4181_v56  ;;  %v1969_v49 = vrot.slane %v4124_v62, 1  ;;  %v4226_v36 = vld [vmem:[#allocation2 + $0x90] sm:$0xff]   ;;  %v2340_v44 = vshrl.u32 %v4165_v50, 16 }
  0x74   : > { %v1750_v3 = vsel %vm1090_vm10, %v1745_v53, %v1749_v52  ;;  %762 = vst [vmem:[#allocation2 + $0xa4] sm:$0x1] %v761_v51  ;;  %v2344_v8 = vrot.slane %v2342_v9, 1  ;;  %v1970_v28 = vrot.slane %v4145_v18, 1  ;;  %v1968_v34 = vsel %vm1348_vm9, %v1966_v32, %v1967_v24  ;;  %v340_v51 = vld [vmem:[%s3725_s19 + $0x68] sm:$0xf] }
  0x75   : > { %v1833_v21 = vrot.slane %v1831_v46, 1  ;;  %v4175_v63 = vld [vmem:[#allocation2 + $0x98] ss:$0 sps:$4 sm:$0x11]   ;;  %v2347_v59 = vshll.u32 %v4185_v39, 16  ;;  %v2354_v47 = vshll.u32 %v4198_v31, 16  ;;  %v1841_v14 = vor.u32 %v1840_v10, %v1836_v4 }
  0x76   : > { %1417 = vrot.lane.b32.xlu1 %v1381_v0, %s3650_s21  ;;  %v4191_v2 = vld [vmem:[#allocation2 + $0x9c] sm:$0xff]   ;;  %v1843_v13 = vshll.u32 %v4175_v63, 16  ;;  %v4231_v29 = vld [vmem:[#allocation2 + $0x98] ss:$0 sps:$4 sm:$0x11]   ;;  %v1990_v45 = vrot.slane %v4133_v37, 1  ;;  %v1971_v6 = vsel %vm1348_vm9, %v1969_v49, %v1970_v28  ;;  %v2345_v23 = vor.u32 %v2344_v8, %v2340_v44 }
  0x77   : > { %1403 = vrot.lane.b32.xlu0 %v1360_v41, %s3650_s21  ;;  %v4189_v41 = vld [vmem:[#allocation2 + $0x3c] sm:$0xff]   ;;  %1039 = vst.msk [vmem:[#allocation3 + $0x68] sm:$0xff] %vm1025_vm11, %v4191_v2  ;;  %v1991_v18 = vrot.slane %v4140_v16, 1  ;;  %v1993_v19 = vrot.slane %v4162_v43, 1  ;;  %v2436_v0 = vshrl.u32 %v4226_v36, 16  ;;  %v1994_v22 = vrot.slane %v4175_v63, 1 }
  0x78   : > { %1031 = vst.msk [vmem:[#allocation3 + $0x28] sm:$0xff] %vm1025_vm11, %v4189_v41  ;;  %v1845_v15 = vrot.slane %v1843_v13, 1  ;;  %v4239_v17 = vld [vmem:[#allocation2 + $0x9c] sm:$0xff]   ;;  %v2438_v26 = vshll.u32 %v4226_v36, 16  ;;  %v2349_v48 = vrot.slane %v2347_v59, 1  ;;  %v2352_v16 = vshrl.u32 %v4198_v31, 16 }
  0x79   : > { %v2356_v35 = vrot.slane %v2354_v47, 1  ;;  %v2450_v30 = vshll.u32 %v4239_v17, 16  ;;  %v4254_v5 = vld [vmem:[#allocation2 + $0x38] ss:$0 sps:$4 sm:$0x11]   ;;  %v1992_v55 = vsel %vm1348_vm9, %v1990_v45, %v1991_v18  ;;  %v2578_v57 = vrot.slane %v4165_v50, 1 }
  0x7a   : > { %1419 = vrot.lane.b32.xlu1 %v1384_v25, %s3650_s21  ;;  %v1846_v38 = vsel %vm1090_vm10, %v1841_v14, %v1845_v15  ;;  %v4256_v40 = vld [vmem:[#allocation2 + $0x44] ss:$0 sps:$4 sm:$0x11]   ;;  %v1142_v25 = vshll.u32 %v4178_v61, 16  ;;  %v324_v46 = vld [vmem:[%s3725_s19 + $0x28] sm:$0xf] }
  0x7b   : > { %1594 = vrot.lane.b32.xlu0 %v4094_v12, %s3649_s20  ;;  %v1829_v12 = vor.u32 %v1828_v42, %v1824_v54  ;;  %v1995_v54 = vsel %vm1348_vm9, %v1993_v19, %v1994_v22  ;;  %v4263_v20 = vrot.slane %v2438_v26, 1  ;;  %v2350_v42 = vsel %vm1090_vm10, %v2345_v23, %v2349_v48  ;;  %v243_v63 = vld [vmem:[#allocation2 + $0xa8] sm:$0x1]  ;;  %v341_v10 = vld [vmem:[%s3725_s19 + $0x6c] sm:$0xf] }
  0x7c   : > { %v2579_v52 = vrot.slane %v4185_v39, 1  ;;  %v2357_v60 = vor.u32 %v2356_v35, %v2352_v16  ;;  %v2448_v9 = vshrl.u32 %v4239_v17, 16  ;;  %v2603_v7 = vrot.slane %v4231_v29, 1 }
  0x7d   : > { %v1140_v32 = vshrl.u32 %v4178_v61, 16  ;;  %v4279_v4 = vrot.slane %v1142_v25, 1  ;;  %v1236_v24 = vshrl.u32 %v4181_v56, 16  ;;  %v2359_v13 = vshll.u32 %v4256_v40, 16 }
  0x7e   : > { %1610 = vrot.lane.b32.xlu1 %v4133_v37, %s3649_s20  ;;  %v2443_v37 = vshll.u32 %v4231_v29, 16  ;;  %v1147_v49 = vshll.u32 %v4254_v5, 16  ;;  %v434_v8 = vshrl.u32 %v324_v46, 16  ;;  %v437_v28 = vshll.u32 %v324_v46, 16  ;;  %v275_v46 = vld [vmem:[#allocation2 + $0x50] sm:$0x1] }
  0x7f   : > { %1596 = vrot.lane.b32.xlu0 %v4124_v62, %s3649_s20  ;;  %v1834_v62 = vsel %vm1090_vm10, %v1829_v12, %v1833_v21  ;;  %v2602_v21 = vrot.slane %v4226_v36, 1  ;;  %v1238_v12 = vshll.u32 %v4181_v56, 16  ;;  %v244_v47 = vsel %vm3697_vm2, 0, %v243_v63 }
  0x80   : > { %v4269_v53 = vrot.slane %v2443_v37, 1  ;;  %v436_v14 = vrot.slane %v434_v8, 7  ;;  %245 = vst [vmem:[#allocation2 + $0xa8] sm:$0x1] %v244_v47  ;;  %v570_v15 = vshrl.u32 %v340_v51, 16  ;;  %v573_v45 = vshll.u32 %v340_v51, 16 }
  0x81   : > { %v578_v18 = vshrl.u32 %v341_v10, 16  ;;  %v2581_v22 = vrot.slane %v4198_v31, 1  ;;  %v581_v26 = vshll.u32 %v341_v10, 16  ;;  %v2605_v48 = vrot.slane %v4239_v17, 1 }
  0x82   : > { %1612 = vrot.lane.b32.xlu1 %v4162_v43, %s3649_s20  ;;  %v219_v43 = vld [vmem:[#allocation2 + $0x48] sm:$0x1]  ;;  %v440_v37 = vrot.slane %v436_v14, 4  ;;  %v572_v16 = vrot.slane %v570_v15, 7  ;;  %v439_v25 = vor.u32 %v437_v28, %v436_v14  ;;  %v276_v28 = vsel %vm3716_vm4, 0, %v275_v46 }
  0x83   : > { %1899 = vrot.lane.b32.xlu0 %v1738_v58, %s3652_s23  ;;  %v325_v58 = vld [vmem:[%s3725_s19 + $0x2c] sm:$0xf]  ;;  %v220_v44 = vsel %vm3697_vm2, 0, %v219_v43  ;;  %v4305_v35 = vrot.slane %v578_v18, 7  ;;  %277 = vst [vmem:[#allocation2 + $0x50] sm:$0x1] %v276_v28 }
  0x84   : > { %221 = vst [vmem:[#allocation2 + $0x48] sm:$0x1] %v220_v44  ;;  %v445_v59 = vshll.u32 %v325_v58, 16  ;;  %v575_v63 = vor.u32 %v573_v45, %v572_v16  ;;  %v576_v51 = vrot.slane %v572_v16, 4  ;;  %v299_v44 = vld [vmem:[#allocation2 + $0xb0] sm:$0x1] }
  0x85   : > { %v222_v15 = vld [vmem:[#allocation2 + $0x54] sm:$0x1]  ;;  %v1152_v18 = vshrl.u32 %v4189_v41, 16  ;;  %v4352_v16 = vld [vmem:[#allocation2 + $0x44] ss:$0 sps:$4 sm:$0x11]  }
  0x86   : > { %1915 = vrot.lane.b32.xlu1 %v1834_v62, %s3652_s23  ;;  %v4293_v62 = vld [vmem:[#allocation2 + $0x98] ss:$0 sps:$4 sm:$0x11]   ;;  %v2582_v39 = vrot.slane %v4256_v40, 1 }
  0x87   : > { %1901 = vrot.lane.b32.xlu0 %v1750_v3, %s3652_s23  ;;  %v4277_v3 = vrot.slane %v2450_v30, 1  ;;  %v4308_v30 = vrot.slane %v1147_v49, 1  ;;  %v763_v14 = vld [vmem:[#allocation2 + $0xa8] sm:$0xf] }
  0x8a   : > { %1917 = vrot.lane.b32.xlu1 %v1846_v38, %s3652_s23  ;;  %v2361_v38 = vrot.slane %v2359_v13, 1  ;;  %v1154_v13 = vshll.u32 %v4189_v41, 16 }
  0x8b   : > { %2012 = vrot.lane.b32.xlu0 %v1968_v34, %s3653_s24  ;;  %v442_v34 = vshrl.u32 %v325_v58, 16  ;;  %v4313_v58 = vld [vmem:[#allocation2 + $0xa4] ss:$0 sps:$4 sm:$0x11]   ;;  %v707_v49 = vld [vmem:[#allocation2 + $0x48] sm:$0xf] }
  0x8c   : > { %v708_v47 = vsel %vm3745_vm8, %v439_v25, %v707_v49  ;;  %v2455_v45 = vshll.u32 %v4313_v58, 16  ;;  %v246_v25 = vld [vmem:[#allocation2 + $0xb4] sm:$0x1] }
  0x8d   : > { %v4300_v23 = vrot.slane %v442_v34, 7  ;;  %v2362_v34 = vsel %vm1090_vm10, %v2357_v60, %v2361_v38  ;;  %709 = vst [vmem:[#allocation2 + $0x48] sm:$0xf] %v708_v47  ;;  %v326_v60 = vld [vmem:[%s3725_s19 + $0x30] sm:$0xf]  ;;  %v2604_v47 = vsel %vm1348_vm9, %v2602_v21, %v2603_v7 }
  0x8e   : > { %2028 = vrot.lane.b32.xlu1 %v1992_v55, %s3653_s24  ;;  %v327_v38 = vld [vmem:[%s3725_s19 + $0x34] sm:$0xf]  ;;  %v451_v46 = vshrl.u32 %v326_v60, 16  ;;  %v454_v40 = vshll.u32 %v326_v60, 16 }
  0x8f   : > { %2014 = vrot.lane.b32.xlu0 %v1971_v6, %s3653_s24  ;;  %v4297_v6 = vrot.slane %v1238_v12, 1  ;;  %v447_v43 = vor.u32 %v445_v59, %v4300_v23  ;;  %v583_v12 = vor.u32 %v581_v26, %v4305_v35  ;;  %v2580_v26 = vsel %vm1348_vm9, %v2578_v57, %v2579_v52  ;;  %v343_v49 = vld [vmem:[%s3725_s19 + $0x74] sm:$0xf]  ;;  %v4402_v7 = vld [vmem:[#allocation2 + $0xa4] ss:$0 sps:$4 sm:$0x11]  }
  0x90   : > { %v449_v57 = vrot.slane %v4300_v23, 4  ;;  %v223_v52 = vsel %vm3697_vm2, 0, %v222_v15  ;;  %v585_v23 = vrot.slane %v4305_v35, 4  ;;  %v1159_v35 = vshll.u32 %v4352_v16, 16 }
  0x91   : > { %v448_v10 = vsel %vm3736_vm7, %v440_v37, %v447_v43  ;;  %v584_v8 = vsel %vm3736_vm7, %v576_v51, %v583_v12  ;;  %v1145_v37 = vor.u32 %v4279_v4, %v1140_v32  ;;  %v2453_v4 = vor.u32 %v4277_v3, %v2448_v9  ;;  %224 = vst [vmem:[#allocation2 + $0x54] sm:$0x1] %v223_v52  ;;  %v711_v3 = vld [vmem:[#allocation2 + $0x50] sm:$0x1] }
  0x92   : > { %2030 = vrot.lane.b32.xlu1 %v1995_v54, %s3653_s24  ;;  %v1243_v54 = vshll.u32 %v4293_v62, 16  ;;  %710 = vst.msk [vmem:[#allocation2 + $0x4c] sm:$0xf] %vm669_vm6, %v448_v10  ;;  %766 = vst.msk [vmem:[#allocation2 + $0xac] sm:$0xf] %vm669_vm6, %v584_v8  ;;  %v459_v51 = vshrl.u32 %v327_v38, 16  ;;  %v712_v8 = vsel %vm3697_vm2, %v449_v57, %v711_v3 }
  0x93   : > { %2206 = vrot.lane.b32.xlu0 %v4165_v50, %s3654_s25  ;;  %v1156_v50 = vrot.slane %v1154_v13, 1  ;;  %v247_v12 = vsel %vm3697_vm2, 0, %v246_v25  ;;  %v342_v10 = vld [vmem:[%s3725_s19 + $0x70] sm:$0xf]  ;;  %v453_v13 = vrot.slane %v451_v46, 7  ;;  %v1150_v9 = vsel %vm1090_vm10, %v1145_v37, %v4308_v30 }
  0x94   : > { %v4295_v19 = vpop.permute.xlu1 %1606  ;;  %248 = vst [vmem:[#allocation2 + $0xb4] sm:$0x1] %v247_v12  ;;  %713 = vst [vmem:[#allocation2 + $0x50] sm:$0x1] %v712_v8  ;;  %v590_v60 = vshll.u32 %v342_v10, 16  ;;  %v595_v25 = vshrl.u32 %v343_v49, 16 }
  0x95   : > { %v4311_v55 = vpop.permute.xlu0 %1590  ;;  %v456_v28 = vor.u32 %v454_v40, %v453_v13  ;;  %v457_v15 = vrot.slane %v453_v13, 4  ;;  %v1157_v21 = vor.u32 %v1156_v50, %v1152_v18  ;;  %v1250_v18 = vshll.u32 %v4191_v2, 16 }
  0x96   : > { %2222 = vrot.lane.b32.xlu1 %v4226_v36, %s3654_s25  ;;  %v2583_v36 = vsel %vm1348_vm9, %v2581_v22, %v2582_v39  ;;  %v598_v50 = vshll.u32 %v343_v49, 16  ;;  %v4418_v40 = vrot.slane %v595_v25, 7 }
  0x97   : > { %2208 = vrot.lane.b32.xlu0 %v4198_v31, %s3654_s25  ;;  %v1245_v31 = vrot.slane %v1243_v54, 1  ;;  %v1252_v49 = vrot.slane %v1250_v18, 1  ;;  %v1388_v18 = vrot.slane %v4191_v2, 1 }
  0x98   : > { %v4332_v59 = vpop.permute.xlu1 %1608  ;;  %v600_v13 = vor.u32 %v598_v50, %v4418_v40 }
  0x99   : > { %v4408_v57 = vld [vmem:[#allocation2 + $0x48] sm:$0xff]  }
  0x9a   : > { %2224 = vrot.lane.b32.xlu1 %v4239_v17, %s3654_s25  ;;  %1032 = vst.msk [vmem:[#allocation3 + $0x30] sm:$0xff] %vm1025_vm11, %v4408_v57 }
  0x9b   : > { %2511 = vrot.lane.b32.xlu0 %v2350_v42, %s3655_s26  ;;  %v2441_v42 = vor.u32 %v4263_v20, %v2436_v0  ;;  %v764_v0 = vsel %vm3745_vm8, %v575_v63, %v763_v14  ;;  %v300_v20 = vsel %vm3716_vm4, 0, %v299_v44  ;;  %v2457_v63 = vrot.slane %v2455_v45, 1  ;;  %v770_v52 = vld [vmem:[#allocation2 + $0xb4] sm:$0xf] }
  0x9c   : > { %765 = vst [vmem:[#allocation2 + $0xa8] sm:$0xf] %v764_v0  ;;  %301 = vst [vmem:[#allocation2 + $0xb0] sm:$0x1] %v300_v20  ;;  %v4356_v43 = vpop.permute.xlu0 %1592  ;;  %v4389_v45 = vrot.slane %v459_v51, 7  ;;  %v1241_v0 = vor.u32 %v4297_v6, %v1236_v24  ;;  %v1361_v51 = vrot.slane %v4178_v61, 1 }
  0x9d   : > { %v2446_v32 = vsel %vm1090_vm10, %v2441_v42, %v4269_v53  ;;  %v462_v53 = vshll.u32 %v327_v38, 16  ;;  %v587_v42 = vshrl.u32 %v342_v10, 16  ;;  %v714_v6 = vld [vmem:[#allocation2 + $0x54] sm:$0xf]  ;;  %v1362_v10 = vrot.slane %v4254_v5, 1  ;;  %v4441_v5 = vld [vmem:[#allocation2 + $0x3c] sm:$0xff]  }
  0x9e   : > { %2527 = vrot.lane.b32.xlu1 %v2446_v32, %s3655_s26  ;;  %v715_v37 = vsel %vm3745_vm8, %v456_v28, %v714_v6  ;;  %v2606_v61 = vrot.slane %v4313_v58, 1  ;;  %v1754_v17 = vshll.u32 %v4441_v5, 16  ;;  %v1752_v6 = vshrl.u32 %v4441_v5, 16 }
  0x9f   : > { %2513 = vrot.lane.b32.xlu0 %v2362_v34, %s3655_s26  ;;  %v2458_v34 = vsel %vm1090_vm10, %v2453_v4, %v2457_v63  ;;  %v464_v24 = vor.u32 %v462_v53, %v4389_v45  ;;  %v589_v38 = vrot.slane %v587_v42, 7  ;;  %716 = vst [vmem:[#allocation2 + $0x54] sm:$0xf] %v715_v37  ;;  %v1248_v63 = vshrl.u32 %v4191_v2, 16  ;;  %v302_v42 = vld [vmem:[#allocation2 + $0xbc] sm:$0x1] }
  0xa0   : > { %v4497_v37 = vld [vmem:[#allocation2 + $0x50] ss:$0 sps:$4 sm:$0x11]  }
  0xa1   : > { %v4373_v44 = vpop.permute.xlu1 %1413  ;;  %v465_v39 = vsel %vm3736_vm7, %v457_v15, %v464_v24  ;;  %v592_v4 = vor.u32 %v590_v60, %v589_v38  ;;  %v593_v46 = vrot.slane %v589_v38, 4  ;;  %v1253_v15 = vor.u32 %v1252_v49, %v1248_v63  ;;  %v4485_v60 = vld [vmem:[#allocation2 + $0x48] sm:$0xff]  }
  0xa2   : > { %2529 = vrot.lane.b32.xlu1 %v2458_v34, %s3655_s26  ;;  %717 = vst.msk [vmem:[#allocation2 + $0x58] sm:$0xf] %vm669_vm6, %v465_v39  ;;  %v1364_v34 = vrot.slane %v4189_v41, 1  ;;  %v466_v24 = vrot.slane %v4389_v45, 4  ;;  %v602_v45 = vrot.slane %v4418_v40, 4  ;;  %v1766_v25 = vshll.u32 %v4485_v60, 16 }
  0xa3   : > { %2624 = vrot.lane.b32.xlu0 %v2580_v26, %s3656_s29  ;;  %v767_v14 = vld [vmem:[#allocation2 + $0xb0] sm:$0x1]  ;;  %v1161_v26 = vrot.slane %v1159_v35, 1  ;;  %v4415_v32 = vld [vmem:[#allocation2 + $0xa8] sm:$0xff]   ;;  %v771_v53 = vsel %vm3745_vm8, %v592_v4, %v770_v52  ;;  %v278_v35 = vld [vmem:[#allocation2 + $0x5c] sm:$0x1]  ;;  %v601_v8 = vsel %vm3736_vm7, %v593_v46, %v600_v13 }
  0xa4   : > { %v768_v29 = vsel %vm3697_vm2, %v585_v23, %v767_v14  ;;  %v1255_v23 = vshll.u32 %v4402_v7, 16  ;;  %1040 = vst.msk [vmem:[#allocation3 + $0x70] sm:$0xff] %vm1025_vm11, %v4415_v32  ;;  %772 = vst [vmem:[#allocation2 + $0xb4] sm:$0xf] %v771_v53  ;;  %v2607_v14 = vsel %vm1348_vm9, %v2605_v48, %v2606_v61  ;;  %v303_v48 = vsel %vm3716_vm4, 0, %v302_v42  ;;  %v4520_v63 = vld [vmem:[#allocation2 + $0xa8] sm:$0xff]  }
  0xa5   : > { %v1398_v30 = vpop.permute.xlu0 %1397  ;;  %769 = vst [vmem:[#allocation2 + $0xb0] sm:$0x1] %v768_v29  ;;  %v1162_v12 = vsel %vm1090_vm10, %v1157_v21, %v1161_v26  ;;  %773 = vst.msk [vmem:[#allocation2 + $0xb8] sm:$0xf] %vm669_vm6, %v601_v8  ;;  %v1756_v26 = vrot.slane %v1754_v17, 1  ;;  %v1389_v39 = vrot.slane %v4402_v7, 1 }
  0xa6   : > { %2640 = vrot.lane.b32.xlu1 %v2604_v47, %s3656_s29  ;;  %v1257_v58 = vrot.slane %v1255_v23, 1  ;;  %v1365_v47 = vrot.slane %v4352_v16, 1  ;;  %304 = vst [vmem:[#allocation2 + $0xbc] sm:$0x1] %v303_v48  ;;  %v1764_v23 = vshrl.u32 %v4485_v60, 16  ;;  %v1972_v17 = vrot.slane %v4441_v5, 1 }
  0xa7   : > { %v4394_v20 = vpop.permute.xlu1 %1415  ;;  %1291 = vrot.lane.b32.xlu0 %v1150_v9, %s3651_s22  ;;  %v1246_v9 = vsel %vm1090_vm10, %v1241_v0, %v1245_v31  ;;  %v4512_v4 = vld [vmem:[#allocation2 + $0xa4] ss:$0 sps:$4 sm:$0x11]   ;;  %v1757_v2 = vor.u32 %v1756_v26, %v1752_v6  ;;  %v249_v53 = vld [vmem:[#allocation2 + $0xc0] sm:$0x1]  ;;  %v1975_v26 = vrot.slane %v4485_v60, 1 }
  0xa8   : > { %v1366_v29 = vsel %vm1348_vm9, %v1364_v34, %v1365_v47  ;;  %v1855_v49 = vshll.u32 %v4512_v4, 16  ;;  %v344_v42 = vld [vmem:[%s3725_s19 + $0x78] sm:$0xf] }
  0xa9   : > { %v1400_v22 = vpop.permute.xlu0 %1399  ;;  %v4465_v41 = vld [vmem:[#allocation2 + $0x54] sm:$0xff]   ;;  %v604_v47 = vshrl.u32 %v344_v42, 16 }
  0xaa   : > { %1307 = vrot.lane.b32.xlu1 %v1246_v9, %s3651_s22  ;;  %1033 = vst.msk [vmem:[#allocation3 + $0x38] sm:$0xff] %vm1025_vm11, %v4465_v41 }
  0xab   : > { %2626 = vrot.lane.b32.xlu0 %v2583_v36, %s3656_s29  ;;  %v1286_v54 = vpop.permute.xlu1 %1285  ;;  %v1386_v36 = vrot.slane %v4293_v62, 1 }
  0xac   : > { %1333 = vst.msk [vmem:[#allocation3 + $0x8] sm:$0xff] %vm1331_vm12, %v1286_v54  ;;  %v4500_v38 = vld [vmem:[#allocation2 + $0xb4] sm:$0xff]   ;;  %v4536_v34 = vld [vmem:[#allocation2 + $0xb0] ss:$0 sps:$4 sm:$0x11]  }
  0xad   : > { %v1284_v3 = vpop.permute.xlu0 %1283  ;;  %1447 = vst.msk [vmem:[#allocation3 + $0x8] sm:$0xff] %vm1445_vm13, %v1400_v22  ;;  %v774_v46 = vld [vmem:[#allocation2 + $0xbc] sm:$0x1] }
  0xae   : > { %1332 = vst.msk [vmem:[#allocation3] sm:$0xff] %vm1331_vm12, %v1284_v3  ;;  %2642 = vrot.lane.b32.xlu1 %v2607_v14, %s3656_s29  ;;  %v775_v54 = vsel %vm3697_vm2, %v602_v45, %v774_v46  ;;  %v607_v14 = vshll.u32 %v344_v42, 16  ;;  %v2000_v42 = vrot.slane %v4536_v34, 1 }
  0xaf   : > { %1640 = vst.msk [vmem:[#allocation3 + $0x8] sm:$0xff] %vm1638_vm14, %v4356_v43  ;;  %1293 = vrot.lane.b32.xlu0 %v1162_v12, %s3651_s22  ;;  %v1302_v28 = vpop.permute.xlu1 %1301  ;;  %v1363_v43 = vsel %vm1348_vm9, %v1361_v51, %v1362_v10  ;;  %v1768_v51 = vrot.slane %v1766_v25, 1  ;;  %v1771_v12 = vshll.u32 %v4497_v37, 16  ;;  %776 = vst [vmem:[#allocation2 + $0xbc] sm:$0x1] %v775_v54  ;;  %v1390_v10 = vsel %vm1348_vm9, %v1388_v18, %v1389_v39 }
  0xb0   : > { %1446 = vst.msk [vmem:[#allocation3] sm:$0xff] %vm1445_vm13, %v1398_v30  ;;  %v279_v30 = vsel %vm3716_vm4, 0, %v278_v35 }
  0xb1   : > { %1341 = vst.msk [vmem:[#allocation3 + $0x48] sm:$0xff] %vm1331_vm12, %v1302_v28  ;;  %v1300_v0 = vpop.permute.xlu0 %1299  ;;  %280 = vst [vmem:[#allocation2 + $0x5c] sm:$0x1] %v279_v30  ;;  %v1769_v35 = vor.u32 %v1768_v51, %v1764_v23  ;;  %v1773_v8 = vrot.slane %v1771_v12, 1  ;;  %v250_v28 = vsel %vm3697_vm2, 0, %v249_v53 }
  0xb2   : > { %1639 = vst.msk [vmem:[#allocation3] sm:$0xff] %vm1638_vm14, %v4311_v55  ;;  %v3599_v55 = vld [vmem:[%s5055_s1 + $0x10] ss:$0 sps:$4 sm:$0x33]   ;;  %251 = vst [vmem:[#allocation2 + $0xc0] sm:$0x1] %v250_v28 }
  0xb3   : > { %1455 = vst.msk [vmem:[#allocation3 + $0x48] sm:$0xff] %vm1445_vm13, %v4394_v20  ;;  %1405 = vrot.lane.b32.xlu0 %v1363_v43, %s3650_s21  ;;  %v1912_v16 = vpop.permute.xlu1 %1911  ;;  %v4476_v20 = vld [vmem:[#allocation2 + $0x44] ss:$0 sps:$4 sm:$0x11]   ;;  %3490 = vmatprep.subr.msk.bf16.mxu0 %vm2777_vm0, %v3599_v55  ;;  %v305_v23 = vld [vmem:[#allocation2 + $0xc8] sm:$0x1] }
  0xb4   : > { %1340 = vst.msk [vmem:[#allocation3 + $0x40] sm:$0xff] %vm1331_vm12, %v1300_v0  ;;  %3491 = vmatprep.subr.msk.bf16.mxu1 %vm2777_vm0, %v3599_v55  ;;  %v1759_v62 = vshll.u32 %v4476_v20, 16  ;;  %v1857_v0 = vrot.slane %v1855_v49, 1  ;;  %v1973_v48 = vrot.slane %v4476_v20, 1  ;;  %v1999_v28 = vrot.slane %v4520_v63, 1 }
  0xb5   : > { %1648 = vst.msk [vmem:[#allocation3 + $0x48] sm:$0xff] %vm1638_vm14, %v4332_v59  ;;  %v1385_v59 = vrot.slane %v4181_v56, 1  ;;  %v1896_v21 = vpop.permute.xlu0 %1895  ;;  %v2779_v56 = vsel %vm2777_vm0, %v3599_v55, 0  ;;  %v1774_v55 = vsel %vm1090_vm10, %v1769_v35, %v1773_v8  ;;  %v252_v35 = vld [vmem:[#allocation2 + $0xcc] sm:$0x1] }
  0xb6   : > { %1454 = vst.msk [vmem:[#allocation3 + $0x40] sm:$0xff] %vm1445_vm13, %v4373_v44  ;;  %v1258_v44 = vsel %vm1090_vm10, %v1253_v15, %v1257_v58  ;;  %3451 = vmatpush3.bf16.msra.mxu0 %v2779_v56  ;;  %3489 = vmatpush3.bf16.msra.mxu1 %v2779_v56  ;;  %v1761_v40 = vrot.slane %v1759_v62, 1  ;;  %v1862_v58 = vshll.u32 %v4520_v63, 16  ;;  %v1974_v20 = vsel %vm1348_vm9, %v1972_v17, %v1973_v48 }
  0xb7   : > { %1647 = vst.msk [vmem:[#allocation3 + $0x40] sm:$0xff] %vm1638_vm14, %v4295_v19  ;;  %v4492_v19 = vld [vmem:[#allocation2 + $0x9c] sm:$0xff]   ;;  %1407 = vrot.lane.b32.xlu0 %v1366_v29, %s3650_s21  ;;  %1309 = vrot.lane.b32.xlu1 %v1258_v44, %s3651_s22  ;;  %v1387_v22 = vsel %vm1348_vm9, %v1385_v59, %v1386_v36  ;;  %v1860_v29 = vshrl.u32 %v4520_v63, 16  ;;  %v1867_v36 = vshll.u32 %v4536_v34, 16  ;;  %v1976_v62 = vrot.slane %v4497_v37, 1 }
  0xb8   : > { %1952 = vst.msk [vmem:[#allocation3 + $0x40] sm:$0xff] %vm1943_vm15, %v1912_v16  ;;  %1944 = vst.msk [vmem:[#allocation3] sm:$0xff] %vm1943_vm15, %v1896_v21  ;;  %v718_v31 = vld [vmem:[#allocation2 + $0x5c] sm:$0x1]  ;;  %v1850_v7 = vshll.u32 %v4492_v19, 16  ;;  %v1762_v9 = vsel %vm1090_vm10, %v1757_v2, %v1761_v40  ;;  %v1848_v61 = vshrl.u32 %v4492_v19, 16  ;;  %v2001_v48 = vsel %vm1348_vm9, %v1999_v28, %v2000_v42 }
  0xb9   : > { %v1898_v50 = vpop.permute.xlu0 %1897  ;;  %v719_v52 = vsel %vm3697_vm2, %v466_v24, %v718_v31  ;;  %1041 = vst.msk [vmem:[#allocation3 + $0x78] sm:$0xff] %vm1025_vm11, %v4500_v38  ;;  %v606_v16 = vrot.slane %v604_v47, 7  ;;  %v1864_v44 = vrot.slane %v1862_v58, 1  ;;  %v345_v21 = vld [vmem:[%s3725_s19 + $0x7c] sm:$0xf]  ;;  %v1977_v40 = vsel %vm1348_vm9, %v1975_v26, %v1976_v62 }
  0xba   : > { %1945 = vst.msk [vmem:[#allocation3 + $0x8] sm:$0xff] %vm1943_vm15, %v1898_v50  ;;  %720 = vst [vmem:[#allocation2 + $0x5c] sm:$0x1] %v719_v52  ;;  %v1852_v3 = vrot.slane %v1850_v7, 1  ;;  %v612_v45 = vshrl.u32 %v345_v21, 16  ;;  %v615_v39 = vshll.u32 %v345_v21, 16 }
  0xbb   : > { %1598 = vrot.lane.b32.xlu0 %v4441_v5, %s3649_s20  ;;  %1421 = vrot.lane.b32.xlu1 %v1387_v22, %s3650_s21  ;;  %v609_v56 = vor.u32 %v607_v14, %v606_v16  ;;  %v4553_v5 = vld [vmem:[#allocation2 + $0x48] sm:$0xff]   ;;  %v777_v25 = vld [vmem:[#allocation2 + $0xc0] sm:$0xf]  ;;  %v1865_v31 = vor.u32 %v1864_v44, %v1860_v29  ;;  %v1869_v22 = vrot.slane %v1867_v36, 1  ;;  %v610_v46 = vrot.slane %v606_v16, 4  ;;  %v4572_v7 = vld [vmem:[#allocation2 + $0x54] sm:$0xff]  }
  0xbc   : > { %v1914_v30 = vpop.permute.xlu1 %1913  ;;  %v1853_v15 = vor.u32 %v1852_v3, %v1848_v61  ;;  %v4563_v2 = vrot.slane %v612_v45, 7  ;;  %v2366_v37 = vshll.u32 %v4553_v5, 16  ;;  %v1996_v12 = vrot.slane %v4492_v19, 1  ;;  %v4611_v29 = vld [vmem:[#allocation2 + $0xb0] ss:$0 sps:$4 sm:$0x11]  }
  0xbd   : > { %v2009_v13 = vpop.permute.xlu0 %2008  ;;  %1953 = vst.msk [vmem:[#allocation3 + $0x48] sm:$0xff] %vm1943_vm15, %v1914_v30  ;;  %v778_v50 = vsel %vm3745_vm8, %v609_v56, %v777_v25  ;;  %v1870_v51 = vsel %vm1090_vm10, %v1865_v31, %v1869_v22  ;;  %v2364_v3 = vshrl.u32 %v4553_v5, 16  ;;  %v2378_v27 = vshll.u32 %v4572_v7, 16  ;;  %v308_v44 = vld [vmem:[#allocation2 + $0xd4] sm:$0x1] }
  0xbe   : > { %2057 = vst.msk [vmem:[#allocation3] sm:$0xff] %vm2056_vm1, %v2009_v13  ;;  %v1858_v6 = vsel %vm1090_vm10, %v1853_v15, %v1857_v0  ;;  %779 = vst [vmem:[#allocation2 + $0xc0] sm:$0xf] %v778_v50  ;;  %v617_v54 = vor.u32 %v615_v39, %v4563_v2  ;;  %v2368_v49 = vrot.slane %v2366_v37, 1  ;;  %v253_v14 = vsel %vm3697_vm2, 0, %v252_v35 }
  0xbf   : > { %1600 = vrot.lane.b32.xlu0 %v4485_v60, %s3649_s20  ;;  %1423 = vrot.lane.b32.xlu1 %v1390_v10, %s3650_s21  ;;  %v4567_v60 = vld [vmem:[#allocation2 + $0x50] ss:$0 sps:$4 sm:$0x11]   ;;  %v1997_v10 = vrot.slane %v4512_v4, 1  ;;  %v306_v4 = vsel %vm3716_vm4, 0, %v305_v23  ;;  %v2380_v34 = vrot.slane %v2378_v27, 1 }
  0xc0   : > { %v2025_v24 = vpop.permute.xlu1 %2024  ;;  %v618_v61 = vsel %vm3736_vm7, %v610_v46, %v617_v54  ;;  %307 = vst [vmem:[#allocation2 + $0xc8] sm:$0x1] %v306_v4  ;;  %v2369_v15 = vor.u32 %v2368_v49, %v2364_v3  ;;  %254 = vst [vmem:[#allocation2 + $0xcc] sm:$0x1] %v253_v14  ;;  %v619_v17 = vrot.slane %v4563_v2, 4  ;;  %v309_v26 = vsel %vm3716_vm4, 0, %v308_v44 }
  0xc1   : > { %v2011_v43 = vpop.permute.xlu0 %2010  ;;  %2065 = vst.msk [vmem:[#allocation3 + $0x40] sm:$0xff] %vm2056_vm1, %v2025_v24  ;;  %v4591_v8 = vld [vmem:[#allocation2 + $0x5c] ss:$0 sps:$4 sm:$0x11]   ;;  %v1998_v58 = vsel %vm1348_vm9, %v1996_v12, %v1997_v10  ;;  %v1166_v25 = vshll.u32 %v4408_v57, 16  ;;  %vm2728_vm4 = vcmask 293888  }
  0xc2   : > { %2058 = vst.msk [vmem:[#allocation3 + $0x8] sm:$0xff] %vm2056_vm1, %v2011_v43  ;;  %310 = vst [vmem:[#allocation2 + $0xd4] sm:$0x1] %v309_v26  ;;  %v4628_v39 = vld [vmem:[#allocation2 + $0xbc] ss:$0 sps:$4 sm:$0x11]  }
  0xc3   : > { %1903 = vrot.lane.b32.xlu0 %v1762_v9, %s3652_s23  ;;  %1614 = vrot.lane.b32.xlu1 %v4492_v19, %s3649_s20  ;;  %v4579_v9 = vld [vmem:[#allocation2 + $0xa8] sm:$0xff]   ;;  %v2371_v19 = vshll.u32 %v4567_v60, 16  ;;  %780 = vst.msk [vmem:[#allocation2 + $0xc4] sm:$0xf] %vm669_vm6, %v618_v61  ;;  %vm2668_vm6 = vcmask 294144   ;;  %v2584_v2 = vrot.slane %v4553_v5, 1 }
  0xc4   : > { %v2027_v52 = vpop.permute.xlu1 %2026  ;;  %v2462_v30 = vshll.u32 %v4579_v9, 16  ;;  %v2460_v21 = vshrl.u32 %v4579_v9, 16  ;;  %v2585_v23 = vrot.slane %v4567_v60, 1  ;;  %v1168_v12 = vrot.slane %v1166_v25, 1 }
  0xc5   : > { %v2203_v59 = vpop.permute.xlu0 %2202  ;;  %2066 = vst.msk [vmem:[#allocation3 + $0x48] sm:$0xff] %vm2056_vm1, %v2027_v52  ;;  %v2373_v0 = vrot.slane %v2371_v19, 1  ;;  %v2479_v33 = vshll.u32 %v4628_v39, 16  ;;  %v4649_v49 = vld [vmem:[#allocation2 + $0xb0] ss:$0 sps:$4 sm:$0x11]  }
  0xc6   : > { %2251 = vst.msk [vmem:[#allocation3] sm:$0xff] %vm2250_vm3, %v2203_v59  ;;  %v4609_v59 = vld [vmem:[#allocation2 + $0xb4] sm:$0xff]   ;;  %v2464_v24 = vrot.slane %v2462_v30, 1  ;;  %v1178_v19 = vshll.u32 %v4465_v41, 16  ;;  %v2586_v35 = vsel %vm1348_vm9, %v2584_v2, %v2585_v23  ;;  %v1262_v14 = vshll.u32 %v4415_v32, 16 }
  0xc7   : > { %1905 = vrot.lane.b32.xlu0 %v1774_v55, %s3652_s23  ;;  %1616 = vrot.lane.b32.xlu1 %v4520_v63, %s3649_s20  ;;  %v2376_v63 = vshrl.u32 %v4572_v7, 16  ;;  %v2383_v55 = vshll.u32 %v4591_v8, 16  ;;  %v2374_v56 = vsel %vm1090_vm10, %v2369_v15, %v2373_v0  ;;  %v2474_v50 = vshll.u32 %v4609_v59, 16  ;;  %v836_v52 = vld [vmem:[#allocation2 + $0xcc] sm:$0xf] }
  0xc8   : > { %v2219_v53 = vpop.permute.xlu1 %2218  ;;  %v2465_v46 = vor.u32 %v2464_v24, %v2460_v21  ;;  %v2608_v0 = vrot.slane %v4579_v9, 1  ;;  %v2609_v1 = vrot.slane %v4611_v29, 1  ;;  %v1367_v2 = vrot.slane %v4408_v57, 1 }
  0xc9   : > { %v2205_v18 = vpop.permute.xlu0 %2204  ;;  %2259 = vst.msk [vmem:[#allocation3 + $0x40] sm:$0xff] %vm2250_vm3, %v2219_v53  ;;  %v2381_v62 = vor.u32 %v2380_v34, %v2376_v63  ;;  %v2385_v45 = vrot.slane %v2383_v55, 1  ;;  %v2476_v61 = vrot.slane %v2474_v50, 1  ;;  %v840_v4 = vld [vmem:[#allocation2 + $0xd4] sm:$0x1]  ;;  %v2587_v63 = vrot.slane %v4572_v7, 1 }
  0xca   : > { %2252 = vst.msk [vmem:[#allocation3 + $0x8] sm:$0xff] %vm2250_vm3, %v2205_v18  ;;  %v2467_v18 = vshll.u32 %v4611_v29, 16  ;;  %v841_v28 = vsel %vm3697_vm2, 0, %v840_v4  ;;  %v1176_v34 = vshrl.u32 %v4465_v41, 16  ;;  %v1264_v29 = vrot.slane %v1262_v14, 1 }
  0xcb   : > { %2016 = vrot.lane.b32.xlu0 %v1974_v20, %s3653_s24  ;;  %1919 = vrot.lane.b32.xlu1 %v1858_v6, %s3652_s23  ;;  %v4619_v6 = vld [vmem:[#allocation2 + $0x50] ss:$0 sps:$4 sm:$0x11]   ;;  %v781_v20 = vld [vmem:[#allocation2 + $0xc8] sm:$0x1]  ;;  %v2386_v54 = vsel %vm1090_vm10, %v2381_v62, %v2385_v45  ;;  %v2610_v62 = vsel %vm1348_vm9, %v2608_v0, %v2609_v1 }
  0xcc   : > { %v2221_v47 = vpop.permute.xlu1 %2220  ;;  %v782_v31 = vsel %vm3697_vm2, %v619_v17, %v781_v20  ;;  %v1171_v37 = vshll.u32 %v4619_v6, 16  ;;  %v2469_v10 = vrot.slane %v2467_v18, 1  ;;  %842 = vst [vmem:[#allocation2 + $0xd4] sm:$0x1] %v841_v28  ;;  %v2588_v17 = vrot.slane %v4591_v8, 1 }
  0xcd   : > { %v2508_v13 = vpop.permute.xlu0 %2507  ;;  %2260 = vst.msk [vmem:[#allocation3 + $0x48] sm:$0xff] %vm2250_vm3, %v2221_v47  ;;  %783 = vst [vmem:[#allocation2 + $0xc8] sm:$0x1] %v782_v31  ;;  %v2481_v47 = vrot.slane %v2479_v33, 1  ;;  %v1274_v18 = vshll.u32 %v4500_v38, 16  ;;  %vm3102_vm2 = vcmask 60416  }
  0xce   : > { %2556 = vst.msk [vmem:[#allocation3] sm:$0xff] %vm2555_vm5, %v2508_v13  ;;  %v1173_v60 = vrot.slane %v1171_v37, 1  ;;  %v2470_v42 = vsel %vm1090_vm10, %v2465_v46, %v2469_v10  ;;  %v2589_v8 = vsel %vm1348_vm9, %v2587_v63, %v2588_v17  ;;  %v1272_v46 = vshrl.u32 %v4500_v38, 16  ;;  %v4728_v14 = vld [vmem:[#allocation2 + $0x68] ss:$0 sps:$4 sm:$0x11]  }
  0xcf   : > { %2018 = vrot.lane.b32.xlu0 %v1977_v40, %s3653_s24  ;;  %1921 = vrot.lane.b32.xlu1 %v1870_v51, %s3652_s23  ;;  %v837_v40 = vsel %vm3745_vm8, 0, %v836_v52  ;;  %v1164_v51 = vshrl.u32 %v4408_v57, 16  ;;  %v1368_v37 = vrot.slane %v4619_v6, 1  ;;  %v1370_v6 = vrot.slane %v4465_v41, 1  ;;  %v4734_v63 = vld [vmem:[#allocation2 + $0xb4] sm:$0xff]  }
  0xd0   : > { %v2524_v36 = vpop.permute.xlu1 %2523  ;;  %838 = vst [vmem:[#allocation2 + $0xcc] sm:$0xf] %v837_v40 }
  0xd1   : > { %v2510_v43 = vpop.permute.xlu0 %2509  ;;  %2564 = vst.msk [vmem:[#allocation3 + $0x40] sm:$0xff] %vm2555_vm5, %v2524_v36  ;;  %v1169_v27 = vor.u32 %v1168_v12, %v1164_v51  ;;  %v1276_v51 = vrot.slane %v1274_v18, 1  ;;  %v1369_v57 = vsel %vm1348_vm9, %v1367_v2, %v1368_v37 }
  0xd2   : > { %2557 = vst.msk [vmem:[#allocation3 + $0x8] sm:$0xff] %vm2555_vm5, %v2510_v43 }
  0xd3   : > { %2210 = vrot.lane.b32.xlu0 %v4553_v5, %s3654_s25  ;;  %2032 = vrot.lane.b32.xlu1 %v1998_v58, %s3653_s24  ;;  %v2472_v5 = vshrl.u32 %v4609_v59, 16  ;;  %v4655_v58 = vld [vmem:[#allocation2 + $0x5c] ss:$0 sps:$4 sm:$0x11]   ;;  %v1174_v55 = vsel %vm1090_vm10, %v1169_v27, %v1173_v60  ;;  %v1391_v27 = vrot.slane %v4415_v32, 1 }
  0xd4   : > { %v2526_v11 = vpop.permute.xlu1 %2525  ;;  %v4712_v60 = vld [vmem:[#allocation2 + $0x5c] ss:$0 sps:$4 sm:$0x11]  }
  0xd5   : > { %v2621_v16 = vpop.permute.xlu0 %2620  ;;  %2565 = vst.msk [vmem:[#allocation3 + $0x48] sm:$0xff] %vm2555_vm5, %v2526_v11  ;;  %v2477_v43 = vor.u32 %v2476_v61, %v2472_v5  ;;  %v2611_v11 = vrot.slane %v4609_v59, 1  ;;  %v1277_v5 = vor.u32 %v1276_v51, %v1272_v46  ;;  %v4773_v51 = vld [vmem:[#allocation2 + $0x60] sm:$0xff]  }
  0xd6   : > { %2669 = vst.msk [vmem:[#allocation3] sm:$0xff] %vm2668_vm6, %v2621_v16  ;;  %v1183_v16 = vshll.u32 %v4655_v58, 16 }
  0xd7   : > { %2212 = vrot.lane.b32.xlu0 %v4572_v7, %s3654_s25  ;;  %2034 = vrot.lane.b32.xlu1 %v2001_v48, %s3653_s24  ;;  %v1180_v48 = vrot.slane %v1178_v19, 1  ;;  %v2482_v44 = vsel %vm1090_vm10, %v2477_v43, %v2481_v47  ;;  %v1267_v7 = vshll.u32 %v4649_v49, 16  ;;  %v4716_v19 = vld [vmem:[#allocation2 + $0x60] sm:$0xff]   ;;  %v1783_v43 = vshll.u32 %v4712_v60, 16 }
  0xd8   : > { %v2637_v3 = vpop.permute.xlu1 %2636  ;;  %v1185_v26 = vrot.slane %v1183_v16, 1 }
  0xd9   : > { %v1288_v22 = vpop.permute.xlu0 %1287  ;;  %2677 = vst.msk [vmem:[#allocation3 + $0x40] sm:$0xff] %vm2668_vm6, %v2637_v3  ;;  %v1181_v20 = vor.u32 %v1180_v48, %v1176_v34  ;;  %v1269_v25 = vrot.slane %v1267_v7, 1  ;;  %v4741_v48 = vld [vmem:[#allocation2 + $0xbc] ss:$0 sps:$4 sm:$0x11]  }
  0xda   : > { %1334 = vst.msk [vmem:[#allocation3 + $0x10] sm:$0xff] %vm1331_vm12, %v1288_v22  ;;  %v4683_v22 = vld [vmem:[#allocation2 + $0xbc] ss:$0 sps:$4 sm:$0x11]  }
  0xdb   : > { %2515 = vrot.lane.b32.xlu0 %v2374_v56, %s3655_s26  ;;  %2226 = vrot.lane.b32.xlu1 %v4579_v9, %s3654_s25  ;;  %v1260_v9 = vshrl.u32 %v4415_v32, 16  ;;  %v1186_v52 = vsel %vm1090_vm10, %v1181_v20, %v1185_v26  ;;  %v1279_v12 = vshll.u32 %v4683_v22, 16  ;;  %v1790_v32 = vshll.u32 %v4716_v19, 16 }
  0xdc   : > { %v1304_v15 = vpop.permute.xlu1 %1303  ;;  %v1395_v0 = vrot.slane %v4683_v22, 1 }
  0xdd   : > { %v2623_v13 = vpop.permute.xlu0 %2622  ;;  %v2685_v53 = vld [vmem:[#allocation3] sm:$0xff]  ;;  %1342 = vst.msk [vmem:[#allocation3 + $0x50] sm:$0xff] %vm1331_vm12, %v1304_v15  ;;  %v1265_v45 = vor.u32 %v1264_v29, %v1260_v9  ;;  %v1281_v61 = vrot.slane %v1279_v12, 1  ;;  %v1394_v15 = vrot.slane %v4500_v38, 1  ;;  %v1788_v38 = vshrl.u32 %v4716_v19, 16  ;;  %v4746_v9 = vld [vmem:[#allocation2 + $0xc0] sm:$0xff]  }
  0xde   : > { %2670 = vst.msk [vmem:[#allocation3 + $0x8] sm:$0xff] %vm2668_vm6, %v2623_v13  ;;  %3452 = vmatprep.mubr.msk.bf16.mxu0 %vm2728_vm4, %v2685_v53  ;;  %v4706_v13 = vld [vmem:[#allocation2 + $0x54] sm:$0xff]   ;;  %v1792_v16 = vrot.slane %v1790_v32, 1  ;;  %v1874_v29 = vshll.u32 %v4734_v63, 16  ;;  %v1884_v37 = vshrl.u32 %v4746_v9, 16 }
  0xdf   : > { %2517 = vrot.lane.b32.xlu0 %v2386_v54, %s3655_s26  ;;  %2228 = vrot.lane.b32.xlu1 %v4609_v59, %s3654_s25  ;;  %v1270_v40 = vsel %vm1090_vm10, %v1265_v45, %v1269_v25  ;;  %v2612_v54 = vrot.slane %v4628_v39, 1  ;;  %v1371_v39 = vrot.slane %v4655_v58, 1  ;;  %v1778_v4 = vshll.u32 %v4706_v13, 16  ;;  %v4757_v25 = vld [vmem:[#allocation2 + $0xc8] ss:$0 sps:$4 sm:$0x11]  }
  0xe0   : > { %v2639_v24 = vpop.permute.xlu1 %2638  ;;  %v2693_v56 = vld [vmem:[#allocation3 + $0x40] sm:$0xff]  ;;  %v1392_v58 = vrot.slane %v4649_v49, 1  ;;  %v1776_v47 = vshrl.u32 %v4706_v13, 16  ;;  %v1876_v45 = vrot.slane %v1874_v29, 1  ;;  %v2006_v32 = vrot.slane %v4757_v25, 1 }
  0xe1   : > { %v1290_v30 = vpop.permute.xlu0 %1289  ;;  %2678 = vst.msk [vmem:[#allocation3 + $0x48] sm:$0xff] %vm2668_vm6, %v2639_v24  ;;  %3468 = vmatprep.mubr.msk.bf16.mxu1 %vm2728_vm4, %v2693_v56  ;;  %v2613_v53 = vsel %vm1348_vm9, %v2611_v11, %v2612_v54  ;;  %v1372_v41 = vsel %vm1348_vm9, %v1370_v6, %v1371_v39  ;;  %v1879_v56 = vshll.u32 %v4741_v48, 16  ;;  %v1978_v11 = vrot.slane %v4706_v13, 1 }
  0xe2   : > { %1335 = vst.msk [vmem:[#allocation3 + $0x18] sm:$0xff] %vm1331_vm12, %v1290_v30  ;;  %v1780_v30 = vrot.slane %v1778_v4, 1  ;;  %v1393_v49 = vsel %vm1348_vm9, %v1391_v27, %v1392_v58  ;;  %v1891_v54 = vshll.u32 %v4757_v25, 16  ;;  %v2388_v27 = vshrl.u32 %v4773_v51, 16 }
  0xe3   : > { %2628 = vrot.lane.b32.xlu0 %v2586_v35, %s3656_s29  ;;  %2531 = vrot.lane.b32.xlu1 %v2470_v42, %s3655_s26  ;;  %v1282_v35 = vsel %vm1090_vm10, %v1277_v5, %v1281_v61  ;;  %v1881_v18 = vrot.slane %v1879_v56, 1  ;;  %v4784_v5 = vld [vmem:[#allocation2 + $0x68] ss:$0 sps:$4 sm:$0x11]   ;;  %v2390_v61 = vshll.u32 %v4773_v51, 16 }
  0xe4   : > { %v1306_v50 = vpop.permute.xlu1 %1305  ;;  %v1781_v17 = vor.u32 %v1780_v30, %v1776_v47  ;;  %v1893_v39 = vrot.slane %v1891_v54, 1 }
  0xe5   : > { %v1402_v36 = vpop.permute.xlu0 %1401  ;;  %v2686_v21 = vld [vmem:[#allocation3 + $0x8] sm:$0xff]  ;;  %1343 = vst.msk [vmem:[#allocation3 + $0x58] sm:$0xff] %vm1331_vm12, %v1306_v50  ;;  %v2392_v58 = vrot.slane %v2390_v61, 1 }
  0xe6   : > { %1448 = vst.msk [vmem:[#allocation3 + $0x10] sm:$0xff] %vm1445_vm13, %v1402_v36  ;;  %3453 = vmatmul.mubr.msk.bf16.vlgmr.msra.gmra.mrb[0].mxu0 %vm2728_vm4, %v2686_v21  ;;  %v1396_v36 = vsel %vm1348_vm9, %v1394_v15, %v1395_v0 }
  0xe7   : > { %1295 = vrot.lane.b32.xlu0 %v1174_v55, %s3651_s22  ;;  %2533 = vrot.lane.b32.xlu1 %v2482_v44, %s3655_s26  ;;  %v1785_v55 = vrot.slane %v1783_v43, 1  ;;  %v1795_v44 = vshll.u32 %v4728_v14, 16  ;;  %v4802_v43 = vld [vmem:[#allocation2 + $0x74] ss:$0 sps:$4 sm:$0x11]   ;;  %v2393_v0 = vor.u32 %v2392_v58, %v2388_v27 }
  0xe8   : > { %v1418_v10 = vpop.permute.xlu1 %1417  ;;  %v2694_v59 = vld [vmem:[#allocation3 + $0x48] sm:$0xff] }
  0xe9   : > { %v1404_v31 = vpop.permute.xlu0 %1403  ;;  %1456 = vst.msk [vmem:[#allocation3 + $0x50] sm:$0xff] %vm1445_vm13, %v1418_v10  ;;  %3469 = vmatmul.mubr.msk.bf16.vlgmr.msra.gmra.mrb[0].mxu1 %vm2728_vm4, %v2694_v59  ;;  %v1786_v24 = vsel %vm1090_vm10, %v1781_v17, %v1785_v55  ;;  %v1797_v20 = vrot.slane %v1795_v44, 1  ;;  %v1981_v10 = vrot.slane %v4716_v19, 1  ;;  %v1982_v59 = vrot.slane %v4728_v14, 1 }
  0xea   : > { %1449 = vst.msk [vmem:[#allocation3 + $0x18] sm:$0xff] %vm1445_vm13, %v1404_v31  ;;  %v1886_v31 = vshll.u32 %v4746_v9, 16  ;;  %v2005_v14 = vrot.slane %v4746_v9, 1  ;;  %v2407_v17 = vshll.u32 %v4802_v43, 16 }
  0xeb   : > { %2630 = vrot.lane.b32.xlu0 %v2589_v8, %s3656_s29  ;;  %2644 = vrot.lane.b32.xlu1 %v2610_v62, %s3656_s29  ;;  %v1793_v8 = vor.u32 %v1792_v16, %v1788_v38  ;;  %v1872_v62 = vshrl.u32 %v4734_v63, 16  ;;  %v4817_v16 = vld [vmem:[#allocation2 + $0xcc] sm:$0xff]   ;;  %v4819_v44 = vld [vmem:[#allocation2 + $0xc8] ss:$0 sps:$4 sm:$0x11]  }
  0xec   : > { %v1420_v3 = vpop.permute.xlu1 %1419 }
  0xed   : > { %v1595_v23 = vpop.permute.xlu0 %1594  ;;  %1457 = vst.msk [vmem:[#allocation3 + $0x58] sm:$0xff] %vm1445_vm13, %v1420_v3  ;;  %v1798_v50 = vsel %vm1090_vm10, %v1793_v8, %v1797_v20  ;;  %v1877_v46 = vor.u32 %v1876_v45, %v1872_v62  ;;  %v4789_v3 = vld [vmem:[#allocation2 + $0x6c] sm:$0xff]   ;;  %v2491_v8 = vshll.u32 %v4819_v44, 16  ;;  %v3623_v20 = vld [vmem:[#allocation2 + $0xd4] ss:$0 sps:$4 sm:$0x11]  }
  0xee   : > { %1641 = vst.msk [vmem:[#allocation3 + $0x10] sm:$0xff] %vm1638_vm14, %v1595_v23  ;;  %v2402_v47 = vshll.u32 %v4789_v3, 16  ;;  %v2593_v54 = vrot.slane %v4789_v3, 1 }
  0xef   : > { %1297 = vrot.lane.b32.xlu0 %v1186_v52, %s3651_s22  ;;  %1311 = vrot.lane.b32.xlu1 %v1270_v40, %s3651_s22  ;;  %v1979_v52 = vrot.slane %v4712_v60, 1  ;;  %v1888_v40 = vrot.slane %v1886_v31, 1  ;;  %v2590_v31 = vrot.slane %v4773_v51, 1 }
  0xf0   : > { %v1611_v42 = vpop.permute.xlu1 %1610  ;;  %v2404_v55 = vrot.slane %v2402_v47, 1 }
  0xf1   : > { %v1597_v33 = vpop.permute.xlu0 %1596  ;;  %1649 = vst.msk [vmem:[#allocation3 + $0x50] sm:$0xff] %vm1638_vm14, %v1611_v42  ;;  %v1980_v12 = vsel %vm1348_vm9, %v1978_v11, %v1979_v52  ;;  %v1889_v6 = vor.u32 %v1888_v40, %v1884_v37  ;;  %v4800_v42 = vld [vmem:[#allocation2 + $0xc0] sm:$0xff]   ;;  %v2496_v52 = vshrl.u32 %v4817_v16, 16 }
  0xf2   : > { %1642 = vst.msk [vmem:[#allocation3 + $0x18] sm:$0xff] %vm1638_vm14, %v1597_v33  ;;  %v1983_v33 = vsel %vm1348_vm9, %v1981_v10, %v1982_v59 }
  0xf3   : > { %1409 = vrot.lane.b32.xlu0 %v1369_v57, %s3650_s21  ;;  %2646 = vrot.lane.b32.xlu1 %v2613_v53, %s3656_s29  ;;  %v1882_v57 = vsel %vm1090_vm10, %v1877_v46, %v1881_v18  ;;  %v1894_v60 = vsel %vm1090_vm10, %v1889_v6, %v1893_v39  ;;  %v2493_v18 = vrot.slane %v2491_v8, 1 }
  0xf4   : > { %v1613_v34 = vpop.permute.xlu1 %1612 }
  0xf5   : > { %v1900_v28 = vpop.permute.xlu0 %1899  ;;  %1650 = vst.msk [vmem:[#allocation3 + $0x58] sm:$0xff] %vm1638_vm14, %v1613_v34  ;;  %v2400_v34 = vshrl.u32 %v4789_v3, 16 }
  0xf6   : > { %1946 = vst.msk [vmem:[#allocation3 + $0x10] sm:$0xff] %vm1943_vm15, %v1900_v28  ;;  %v2395_v28 = vshll.u32 %v4784_v5, 16 }
  0xf7   : > { %1411 = vrot.lane.b32.xlu0 %v1372_v41, %s3650_s21  ;;  %1313 = vrot.lane.b32.xlu1 %v1282_v35, %s3651_s22  ;;  %v2002_v41 = vrot.slane %v4734_v63, 1 }
  0xf8   : > { %v1916_v7 = vpop.permute.xlu1 %1915 }
  0xf9   : > { %v1902_v1 = vpop.permute.xlu0 %1901  ;;  %1954 = vst.msk [vmem:[#allocation3 + $0x50] sm:$0xff] %vm1943_vm15, %v1916_v7  ;;  %v2405_v7 = vor.u32 %v2404_v55, %v2400_v34 }
  0xfa   : > { %1947 = vst.msk [vmem:[#allocation3 + $0x18] sm:$0xff] %vm1943_vm15, %v1902_v1  ;;  %v2397_v1 = vrot.slane %v2395_v28, 1 }
  0xfb   : > { %1602 = vrot.lane.b32.xlu0 %v4706_v13, %s3649_s20  ;;  %1425 = vrot.lane.b32.xlu1 %v1393_v49, %s3650_s21 }
  0xfc   : > { %v1918_v22 = vpop.permute.xlu1 %1917 }
  0xfd   : > { %v2013_v21 = vpop.permute.xlu0 %2012  ;;  %1955 = vst.msk [vmem:[#allocation3 + $0x58] sm:$0xff] %vm1943_vm15, %v1918_v22  ;;  %v2591_v22 = vrot.slane %v4784_v5, 1 }
  0xfe   : > { %2059 = vst.msk [vmem:[#allocation3 + $0x10] sm:$0xff] %vm2056_vm1, %v2013_v21  ;;  %v2398_v21 = vsel %vm1090_vm10, %v2393_v0, %v2397_v1 }
  0xff   : > { %1604 = vrot.lane.b32.xlu0 %v4716_v19, %s3649_s20  ;;  %1427 = vrot.lane.b32.xlu1 %v1396_v36, %s3650_s21  ;;  %v2003_v19 = vrot.slane %v4741_v48, 1  ;;  %v2007_v48 = vsel %vm1348_vm9, %v2005_v14, %v2006_v32  ;;  %v2592_v40 = vsel %vm1348_vm9, %v2590_v31, %v2591_v22 }
 0x100   : > { %v2029_v23 = vpop.permute.xlu1 %2028 }
 0x101   : > { %v2015_v26 = vpop.permute.xlu0 %2014  ;;  %2067 = vst.msk [vmem:[#allocation3 + $0x50] sm:$0xff] %vm2056_vm1, %v2029_v23  ;;  %v2004_v30 = vsel %vm1348_vm9, %v2002_v41, %v2003_v19  ;;  %v2594_v23 = vrot.slane %v4802_v43, 1  ;;  %v2617_v41 = vrot.slane %v4817_v16, 1  ;;  %v2618_v19 = vrot.slane %v3623_v20, 1 }
 0x102   : > { %2060 = vst.msk [vmem:[#allocation3 + $0x18] sm:$0xff] %vm2056_vm1, %v2015_v26  ;;  %v2498_v26 = vshll.u32 %v4817_v16, 16 }
 0x103   : > { %1907 = vrot.lane.b32.xlu0 %v1786_v24, %s3652_s23  ;;  %1618 = vrot.lane.b32.xlu1 %v4734_v63, %s3649_s20  ;;  %v2486_v63 = vshll.u32 %v4800_v42, 16  ;;  %v2409_v24 = vrot.slane %v2407_v17, 1  ;;  %v2595_v6 = vsel %vm1348_vm9, %v2593_v54, %v2594_v23  ;;  %v2619_v27 = vsel %vm1348_vm9, %v2617_v41, %v2618_v19 }
 0x104   : > { %v2031_v53 = vpop.permute.xlu1 %2030  ;;  %v2500_v46 = vrot.slane %v2498_v26, 1 }
 0x105   : > { %v2207_v2 = vpop.permute.xlu0 %2206  ;;  %2068 = vst.msk [vmem:[#allocation3 + $0x58] sm:$0xff] %vm2056_vm1, %v2031_v53  ;;  %v2488_v29 = vrot.slane %v2486_v63, 1  ;;  %v2410_v25 = vsel %vm1090_vm10, %v2405_v7, %v2409_v24  ;;  %v2615_v53 = vrot.slane %v4819_v44, 1 }
 0x106   : > { %2253 = vst.msk [vmem:[#allocation3 + $0x10] sm:$0xff] %vm2250_vm3, %v2207_v2  ;;  %v2503_v2 = vshll.u32 %v3623_v20, 16 }
 0x107   : > { %1909 = vrot.lane.b32.xlu0 %v1798_v50, %s3652_s23  ;;  %1620 = vrot.lane.b32.xlu1 %v4746_v9, %s3649_s20  ;;  %v2484_v9 = vshrl.u32 %v4800_v42, 16 }
 0x108   : > { %v2223_v35 = vpop.permute.xlu1 %2222  ;;  %v2505_v10 = vrot.slane %v2503_v2, 1 }
 0x109   : > { %v2209_v13 = vpop.permute.xlu0 %2208  ;;  %2261 = vst.msk [vmem:[#allocation3 + $0x50] sm:$0xff] %vm2250_vm3, %v2223_v35  ;;  %v2489_v45 = vor.u32 %v2488_v29, %v2484_v9 }
 0x10a   : > { %2254 = vst.msk [vmem:[#allocation3 + $0x18] sm:$0xff] %vm2250_vm3, %v2209_v13  ;;  %v2614_v13 = vrot.slane %v4800_v42, 1 }
 0x10b   : > { %2020 = vrot.lane.b32.xlu0 %v1980_v12, %s3653_s24  ;;  %1923 = vrot.lane.b32.xlu1 %v1882_v57, %s3652_s23  ;;  %v2501_v12 = vor.u32 %v2500_v46, %v2496_v52 }
 0x10c   : > { %v2225_v15 = vpop.permute.xlu1 %2224 }
 0x10d   : > { %v2512_v4 = vpop.permute.xlu0 %2511  ;;  %2262 = vst.msk [vmem:[#allocation3 + $0x58] sm:$0xff] %vm2250_vm3, %v2225_v15  ;;  %v2506_v39 = vsel %vm1090_vm10, %v2501_v12, %v2505_v10 }
 0x10e   : > { %2558 = vst.msk [vmem:[#allocation3 + $0x10] sm:$0xff] %vm2555_vm5, %v2512_v4 }
 0x10f   : > { %2022 = vrot.lane.b32.xlu0 %v1983_v33, %s3653_s24  ;;  %1925 = vrot.lane.b32.xlu1 %v1894_v60, %s3652_s23  ;;  %v2616_v60 = vsel %vm1348_vm9, %v2614_v13, %v2615_v53 }
 0x110   : > { %v2528_v36 = vpop.permute.xlu1 %2527 }
 0x111   : > { %v2514_v49 = vpop.permute.xlu0 %2513  ;;  %2566 = vst.msk [vmem:[#allocation3 + $0x50] sm:$0xff] %vm2555_vm5, %v2528_v36 }
 0x112   : > { %2559 = vst.msk [vmem:[#allocation3 + $0x18] sm:$0xff] %vm2555_vm5, %v2514_v49 }
 0x113   : > { %2214 = vrot.lane.b32.xlu0 %v4773_v51, %s3654_s25  ;;  %2036 = vrot.lane.b32.xlu1 %v2004_v30, %s3653_s24  ;;  %v2494_v51 = vsel %vm1090_vm10, %v2489_v45, %v2493_v18 }
 0x114   : > { %v2530_v62 = vpop.permute.xlu1 %2529 }
 0x115   : > { %v2625_v38 = vpop.permute.xlu0 %2624  ;;  %2567 = vst.msk [vmem:[#allocation3 + $0x58] sm:$0xff] %vm2555_vm5, %v2530_v62 }
 0x116   : > { %2671 = vst.msk [vmem:[#allocation3 + $0x10] sm:$0xff] %vm2668_vm6, %v2625_v38 }
 0x117   : > { %2216 = vrot.lane.b32.xlu0 %v4789_v3, %s3654_s25  ;;  %2038 = vrot.lane.b32.xlu1 %v2007_v48, %s3653_s24 }
 0x118   : > { %v2641_v37 = vpop.permute.xlu1 %2640 }
 0x119   : > { %v1292_v56 = vpop.permute.xlu0 %1291  ;;  %2679 = vst.msk [vmem:[#allocation3 + $0x50] sm:$0xff] %vm2668_vm6, %v2641_v37 }
 0x11a   : > { %1336 = vst.msk [vmem:[#allocation3 + $0x20] sm:$0xff] %vm1331_vm12, %v1292_v56 }
 0x11b   : > { %2519 = vrot.lane.b32.xlu0 %v2398_v21, %s3655_s26  ;;  %2230 = vrot.lane.b32.xlu1 %v4800_v42, %s3654_s25 }
 0x11c   : > { %v1308_v57 = vpop.permute.xlu1 %1307 }
 0x11d   : > { %v2627_v50 = vpop.permute.xlu0 %2626  ;;  %v2687_v11 = vld [vmem:[#allocation3 + $0x10] sm:$0xff]  ;;  %1344 = vst.msk [vmem:[#allocation3 + $0x60] sm:$0xff] %vm1331_vm12, %v1308_v57 }
 0x11e   : > { %2672 = vst.msk [vmem:[#allocation3 + $0x18] sm:$0xff] %vm2668_vm6, %v2627_v50  ;;  %3456 = vmatprep.mubr.msk.bf16.mxu0 %vm2728_vm4, %v2687_v11 }
 0x11f   : > { %2521 = vrot.lane.b32.xlu0 %v2410_v25, %s3655_s26  ;;  %2232 = vrot.lane.b32.xlu1 %v4817_v16, %s3654_s25 }
 0x120   : > { %v2643_v33 = vpop.permute.xlu1 %2642  ;;  %v2695_v3 = vld [vmem:[#allocation3 + $0x50] sm:$0xff] }
 0x121   : > { %v1294_v59 = vpop.permute.xlu0 %1293  ;;  %2680 = vst.msk [vmem:[#allocation3 + $0x58] sm:$0xff] %vm2668_vm6, %v2643_v33  ;;  %3472 = vmatprep.mubr.msk.bf16.mxu1 %vm2728_vm4, %v2695_v3 }
 0x122   : > { %1337 = vst.msk [vmem:[#allocation3 + $0x28] sm:$0xff] %vm1331_vm12, %v1294_v59 }
 0x123   : > { %2632 = vrot.lane.b32.xlu0 %v2592_v40, %s3656_s29  ;;  %2535 = vrot.lane.b32.xlu1 %v2494_v51, %s3655_s26 }
 0x125   : > { %v1406_v5 = vpop.permute.xlu0 %1405  ;;  %v2688_v61 = vld [vmem:[#allocation3 + $0x18] sm:$0xff] }
 0x126   : > { %1450 = vst.msk [vmem:[#allocation3 + $0x20] sm:$0xff] %vm1445_vm13, %v1406_v5  ;;  %3457 = vmatmul.mubr.msk.bf16.gmra.mrb[4].mxu0 %vm2728_vm4, %v2688_v61 }
 0x127   : > { %2634 = vrot.lane.b32.xlu0 %v2595_v6, %s3656_s29  ;;  %2537 = vrot.lane.b32.xlu1 %v2506_v39, %s3655_s26 }
 0x128   : > { %v2696_v42 = vld [vmem:[#allocation3 + $0x58] sm:$0xff] }
 0x129   : > { %v1408_v4 = vpop.permute.xlu0 %1407  ;;  %v1310_v35 = vpop.permute.xlu1 %1309  ;;  %3473 = vmatmul.mubr.msk.bf16.gmra.mrb[4].mxu1 %vm2728_vm4, %v2696_v42 }
 0x12a   : > { %1451 = vst.msk [vmem:[#allocation3 + $0x28] sm:$0xff] %vm1445_vm13, %v1408_v4 }
 0x12b   : > { %1345 = vst.msk [vmem:[#allocation3 + $0x68] sm:$0xff] %vm1331_vm12, %v1310_v35  ;;  %2648 = vrot.lane.b32.xlu1 %v2616_v60, %s3656_s29 }
 0x12d   : > { %v1599_v58 = vpop.permute.xlu0 %1598  ;;  %v1422_v28 = vpop.permute.xlu1 %1421 }
 0x12e   : > { %1643 = vst.msk [vmem:[#allocation3 + $0x20] sm:$0xff] %vm1638_vm14, %v1599_v58 }
 0x12f   : > { %1458 = vst.msk [vmem:[#allocation3 + $0x60] sm:$0xff] %vm1445_vm13, %v1422_v28  ;;  %2650 = vrot.lane.b32.xlu1 %v2619_v27, %s3656_s29 }
 0x131   : > { %v1601_v43 = vpop.permute.xlu0 %1600  ;;  %v1424_v47 = vpop.permute.xlu1 %1423 }
 0x132   : > { %1644 = vst.msk [vmem:[#allocation3 + $0x28] sm:$0xff] %vm1638_vm14, %v1601_v43  ;;  %v4940_v43 = vld [vmem:[%s5056_s2] ss:$0 sm:$0xff] }
 0x133   : > { %1459 = vst.msk [vmem:[#allocation3 + $0x68] sm:$0xff] %vm1445_vm13, %v1424_v47 }
 0x135   : > { %v1904_v30 = vpop.permute.xlu0 %1903  ;;  %v1615_v14 = vpop.permute.xlu1 %1614 }
 0x136   : > { %1948 = vst.msk [vmem:[#allocation3 + $0x20] sm:$0xff] %vm1943_vm15, %v1904_v30 }
 0x137   : > { %1651 = vst.msk [vmem:[#allocation3 + $0x60] sm:$0xff] %vm1638_vm14, %v1615_v14 }
 0x139   : > { %v1906_v32 = vpop.permute.xlu0 %1905  ;;  %v1617_v49 = vpop.permute.xlu1 %1616 }
 0x13a   : > { %1949 = vst.msk [vmem:[#allocation3 + $0x28] sm:$0xff] %vm1943_vm15, %v1906_v32 }
 0x13b   : > { %1652 = vst.msk [vmem:[#allocation3 + $0x68] sm:$0xff] %vm1638_vm14, %v1617_v49 }
 0x13d   : > { %v2017_v15 = vpop.permute.xlu0 %2016  ;;  %v1920_v0 = vpop.permute.xlu1 %1919 }
 0x13e   : > { %2061 = vst.msk [vmem:[#allocation3 + $0x20] sm:$0xff] %vm2056_vm1, %v2017_v15 }
 0x13f   : > { %1956 = vst.msk [vmem:[#allocation3 + $0x60] sm:$0xff] %vm1943_vm15, %v1920_v0 }
 0x141   : > { %v2019_v1 = vpop.permute.xlu0 %2018  ;;  %v1922_v63 = vpop.permute.xlu1 %1921 }
 0x142   : > { %2062 = vst.msk [vmem:[#allocation3 + $0x28] sm:$0xff] %vm2056_vm1, %v2019_v1 }
 0x143   : > { %1957 = vst.msk [vmem:[#allocation3 + $0x68] sm:$0xff] %vm1943_vm15, %v1922_v63 }
 0x145   : > { %v2211_v34 = vpop.permute.xlu0 %2210  ;;  %v2033_v55 = vpop.permute.xlu1 %2032 }
 0x146   : > { %2255 = vst.msk [vmem:[#allocation3 + $0x20] sm:$0xff] %vm2250_vm3, %v2211_v34 }
 0x147   : > { %2069 = vst.msk [vmem:[#allocation3 + $0x60] sm:$0xff] %vm2056_vm1, %v2033_v55 }
 0x149   : > { %v2213_v17 = vpop.permute.xlu0 %2212  ;;  %v2035_v48 = vpop.permute.xlu1 %2034 }
 0x14a   : > { %2256 = vst.msk [vmem:[#allocation3 + $0x28] sm:$0xff] %vm2250_vm3, %v2213_v17 }
 0x14b   : > { %2070 = vst.msk [vmem:[#allocation3 + $0x68] sm:$0xff] %vm2056_vm1, %v2035_v48 }
 0x14d   : > { %v2516_v38 = vpop.permute.xlu0 %2515  ;;  %v2227_v16 = vpop.permute.xlu1 %2226 }
 0x14e   : > { %2560 = vst.msk [vmem:[#allocation3 + $0x20] sm:$0xff] %vm2555_vm5, %v2516_v38 }
 0x14f   : > { %2263 = vst.msk [vmem:[#allocation3 + $0x60] sm:$0xff] %vm2250_vm3, %v2227_v16 }
 0x151   : > { %v2518_v44 = vpop.permute.xlu0 %2517  ;;  %v2229_v36 = vpop.permute.xlu1 %2228 }
 0x152   : > { %2561 = vst.msk [vmem:[#allocation3 + $0x28] sm:$0xff] %vm2555_vm5, %v2518_v44 }
 0x153   : > { %2264 = vst.msk [vmem:[#allocation3 + $0x68] sm:$0xff] %vm2250_vm3, %v2229_v36 }
 0x155   : > { %v2629_v21 = vpop.permute.xlu0 %2628  ;;  %v2532_v9 = vpop.permute.xlu1 %2531 }
 0x156   : > { %2673 = vst.msk [vmem:[#allocation3 + $0x20] sm:$0xff] %vm2668_vm6, %v2629_v21 }
 0x157   : > { %2568 = vst.msk [vmem:[#allocation3 + $0x60] sm:$0xff] %vm2555_vm5, %v2532_v9 }
 0x159   : > { %v1296_v29 = vpop.permute.xlu0 %1295  ;;  %v2534_v7 = vpop.permute.xlu1 %2533 }
 0x15a   : > { %1338 = vst.msk [vmem:[#allocation3 + $0x30] sm:$0xff] %vm1331_vm12, %v1296_v29 }
 0x15b   : > { %2569 = vst.msk [vmem:[#allocation3 + $0x68] sm:$0xff] %vm2555_vm5, %v2534_v7 }
 0x15d   : > { %v2631_v24 = vpop.permute.xlu0 %2630  ;;  %v2689_v56 = vld [vmem:[#allocation3 + $0x20] sm:$0xff]  ;;  %v2645_v8 = vpop.permute.xlu1 %2644 }
 0x15e   : > { %2674 = vst.msk [vmem:[#allocation3 + $0x28] sm:$0xff] %vm2668_vm6, %v2631_v24  ;;  %3460 = vmatprep.mubr.msk.bf16.mxu0 %vm2728_vm4, %v2689_v56  ;;  %2681 = vst.msk [vmem:[#allocation3 + $0x60] sm:$0xff] %vm2668_vm6, %v2645_v8 }
 0x161   : > { %v1298_v20 = vpop.permute.xlu0 %1297  ;;  %v1312_v26 = vpop.permute.xlu1 %1311 }
 0x162   : > { %1339 = vst.msk [vmem:[#allocation3 + $0x38] sm:$0xff] %vm1331_vm12, %v1298_v20  ;;  %1346 = vst.msk [vmem:[#allocation3 + $0x70] sm:$0xff] %vm1331_vm12, %v1312_v26 }
 0x165   : > { %v1410_v62 = vpop.permute.xlu0 %1409  ;;  %v2690_v45 = vld [vmem:[#allocation3 + $0x28] sm:$0xff]  ;;  %v2647_v25 = vpop.permute.xlu1 %2646  ;;  %v2697_v31 = vld [vmem:[#allocation3 + $0x60] sm:$0xff] }
 0x166   : > { %1452 = vst.msk [vmem:[#allocation3 + $0x30] sm:$0xff] %vm1445_vm13, %v1410_v62  ;;  %3461 = vmatmul.mubr.msk.bf16.gmra.mrb[8].mxu0 %vm2728_vm4, %v2690_v45  ;;  %3476 = vmatprep.mubr.msk.bf16.mxu1 %vm2728_vm4, %v2697_v31 }
 0x167   : > { %2682 = vst.msk [vmem:[#allocation3 + $0x68] sm:$0xff] %vm2668_vm6, %v2647_v25 }
 0x169   : > { %v1412_v22 = vpop.permute.xlu0 %1411  ;;  %v1314_v18 = vpop.permute.xlu1 %1313 }
 0x16a   : > { %1453 = vst.msk [vmem:[#allocation3 + $0x38] sm:$0xff] %vm1445_vm13, %v1412_v22 }
 0x16b   : > { %1347 = vst.msk [vmem:[#allocation3 + $0x78] sm:$0xff] %vm1331_vm12, %v1314_v18 }
 0x16d   : > { %v1603_v50 = vpop.permute.xlu0 %1602  ;;  %v1426_v11 = vpop.permute.xlu1 %1425 }
 0x16e   : > { %v2698_v52 = vld [vmem:[#allocation3 + $0x68] sm:$0xff]  ;;  %1645 = vst.msk [vmem:[#allocation3 + $0x30] sm:$0xff] %vm1638_vm14, %v1603_v50 }
 0x16f   : > { %1460 = vst.msk [vmem:[#allocation3 + $0x70] sm:$0xff] %vm1445_vm13, %v1426_v11  ;;  %3477 = vmatmul.mubr.msk.bf16.gmra.mrb[8].mxu1 %vm2728_vm4, %v2698_v52 }
 0x171   : > { %v1605_v46 = vpop.permute.xlu0 %1604  ;;  %v1428_v2 = vpop.permute.xlu1 %1427 }
 0x172   : > { %1646 = vst.msk [vmem:[#allocation3 + $0x38] sm:$0xff] %vm1638_vm14, %v1605_v46 }
 0x173   : > { %1461 = vst.msk [vmem:[#allocation3 + $0x78] sm:$0xff] %vm1445_vm13, %v1428_v2 }
 0x175   : > { %v1908_v37 = vpop.permute.xlu0 %1907  ;;  %v1619_v40 = vpop.permute.xlu1 %1618 }
 0x176   : > { %1950 = vst.msk [vmem:[#allocation3 + $0x30] sm:$0xff] %vm1943_vm15, %v1908_v37 }
 0x177   : > { %1653 = vst.msk [vmem:[#allocation3 + $0x70] sm:$0xff] %vm1638_vm14, %v1619_v40 }
 0x179   : > { %v1910_v54 = vpop.permute.xlu0 %1909  ;;  %v1621_v23 = vpop.permute.xlu1 %1620 }
 0x17a   : > { %1951 = vst.msk [vmem:[#allocation3 + $0x38] sm:$0xff] %vm1943_vm15, %v1910_v54 }
 0x17b   : > { %1654 = vst.msk [vmem:[#allocation3 + $0x78] sm:$0xff] %vm1638_vm14, %v1621_v23 }
 0x17d   : > { %v2021_v51 = vpop.permute.xlu0 %2020  ;;  %v1924_v12 = vpop.permute.xlu1 %1923 }
 0x17e   : > { %2063 = vst.msk [vmem:[#allocation3 + $0x30] sm:$0xff] %vm2056_vm1, %v2021_v51 }
 0x17f   : > { %1958 = vst.msk [vmem:[#allocation3 + $0x70] sm:$0xff] %vm1943_vm15, %v1924_v12 }
 0x181   : > { %v2023_v10 = vpop.permute.xlu0 %2022  ;;  %v1926_v59 = vpop.permute.xlu1 %1925 }
 0x182   : > { %2064 = vst.msk [vmem:[#allocation3 + $0x38] sm:$0xff] %vm2056_vm1, %v2023_v10 }
 0x183   : > { %1959 = vst.msk [vmem:[#allocation3 + $0x78] sm:$0xff] %vm1943_vm15, %v1926_v59 }
 0x185   : > { %v2215_v57 = vpop.permute.xlu0 %2214  ;;  %v2037_v6 = vpop.permute.xlu1 %2036 }
 0x186   : > { %2257 = vst.msk [vmem:[#allocation3 + $0x30] sm:$0xff] %vm2250_vm3, %v2215_v57 }
 0x187   : > { %2071 = vst.msk [vmem:[#allocation3 + $0x70] sm:$0xff] %vm2056_vm1, %v2037_v6 }
 0x189   : > { %v2217_v39 = vpop.permute.xlu0 %2216  ;;  %v2039_v13 = vpop.permute.xlu1 %2038 }
 0x18a   : > { %2258 = vst.msk [vmem:[#allocation3 + $0x38] sm:$0xff] %vm2250_vm3, %v2217_v39 }
 0x18b   : > { %2072 = vst.msk [vmem:[#allocation3 + $0x78] sm:$0xff] %vm2056_vm1, %v2039_v13 }
 0x18d   : > { %v2520_v53 = vpop.permute.xlu0 %2519  ;;  %v2231_v5 = vpop.permute.xlu1 %2230 }
 0x18e   : > { %2562 = vst.msk [vmem:[#allocation3 + $0x30] sm:$0xff] %vm2555_vm5, %v2520_v53 }
 0x18f   : > { %2265 = vst.msk [vmem:[#allocation3 + $0x70] sm:$0xff] %vm2250_vm3, %v2231_v5 }
 0x191   : > { %v2522_v61 = vpop.permute.xlu0 %2521  ;;  %v2233_v33 = vpop.permute.xlu1 %2232 }
 0x192   : > { %2563 = vst.msk [vmem:[#allocation3 + $0x38] sm:$0xff] %vm2555_vm5, %v2522_v61 }
 0x193   : > { %2266 = vst.msk [vmem:[#allocation3 + $0x78] sm:$0xff] %vm2250_vm3, %v2233_v33 }
 0x195   : > { %v2633_v3 = vpop.permute.xlu0 %2632  ;;  %v2536_v60 = vpop.permute.xlu1 %2535 }
 0x196   : > { %2675 = vst.msk [vmem:[#allocation3 + $0x30] sm:$0xff] %vm2668_vm6, %v2633_v3 }
 0x197   : > { %2570 = vst.msk [vmem:[#allocation3 + $0x70] sm:$0xff] %vm2555_vm5, %v2536_v60 }
 0x199   : > { %v2635_v41 = vpop.permute.xlu0 %2634  ;;  %v2538_v19 = vpop.permute.xlu1 %2537 }
 0x19a   : > { %2676 = vst.msk [vmem:[#allocation3 + $0x38] sm:$0xff] %vm2668_vm6, %v2635_v41 }
 0x19b   : > { %2571 = vst.msk [vmem:[#allocation3 + $0x78] sm:$0xff] %vm2555_vm5, %v2538_v19 }
 0x19d   : > { %v2691_v4 = vld [vmem:[#allocation3 + $0x30] sm:$0xff]  ;;  %v2649_v35 = vpop.permute.xlu1 %2648 }
 0x19e   : > { %3464 = vmatprep.mubr.msk.bf16.mxu0 %vm2728_vm4, %v2691_v4  ;;  %2683 = vst.msk [vmem:[#allocation3 + $0x70] sm:$0xff] %vm2668_vm6, %v2649_v35 }
 0x1a1   : > { %v2692_v27 = vld [vmem:[#allocation3 + $0x38] sm:$0xff]  ;;  %v2651_v58 = vpop.permute.xlu1 %2650 }
 0x1a2   : > { %3465 = vmatmul.mubr.msk.bf16.gmra.mrb[12].mxu0 %vm2728_vm4, %v2692_v27  ;;  %2684 = vst.msk [vmem:[#allocation3 + $0x78] sm:$0xff] %vm2668_vm6, %v2651_v58 }
 0x1a5   : > { %v2699_v28 = vld [vmem:[#allocation3 + $0x70] sm:$0xff] }
 0x1a6   : > { %3480 = vmatprep.mubr.msk.bf16.mxu1 %vm2728_vm4, %v2699_v28 }
 0x1a9   : > { %v2700_v42 = vld [vmem:[#allocation3 + $0x78] sm:$0xff] }
 0x1aa   : > { %3481 = vmatmul.mubr.msk.bf16.gmra.mrb[12].mxu1 %vm2728_vm4, %v2700_v42 }
 0x1b9   : > { %v3454_v47 = vpop.f32.mrb[0].mxu0 }
 0x1ba   : > { %v2824_v30 = vadd.f32 %v3454_v47, %v4940_v43  ;;  %v2815_v14 = vpop.f32.mrb[1].mxu0 }
 0x1bb   : > { %v2816_v32 = vadd.f32 %v4940_v43, %v2815_v14  ;;  %v3455_v49 = vpop.f32.mrb[2].mxu0 }
 0x1bc   : > { %v2944_v15 = vmax.f32 %v2824_v30, 0.0  ;;  %v2827_v0 = vadd.f32 %v3455_v49, %v4940_v43  ;;  %v2818_v1 = vpop.f32.mrb[3].mxu0  ;;  %v3470_v36 = vpop.f32.mrb[0].mxu1 }
 0x1bd   : > { %v2942_v63 = vmax.f32 %v2816_v32, 0.0  ;;  %v2819_v34 = vadd.f32 %v4940_v43, %v2818_v1  ;;  %v2888_v21 = vadd.f32 %v3470_v36, %v4940_v43  ;;  %v2879_v9 = vpop.f32.mrb[1].mxu1 }
 0x1be   : > { %v3397_v55 = vpack.c.bf16 %v2944_v15, %v2944_v15  ;;  %v2945_v17 = vmax.f32 %v2827_v0, 0.0  ;;  %v2880_v29 = vadd.f32 %v4940_v43, %v2879_v9  ;;  %v3471_v7 = vpop.f32.mrb[2].mxu1 }
 0x1bf   : > { %v3395_v48 = vpack.c.bf16 %v2942_v63, %v2942_v63  ;;  %v2943_v38 = vmax.f32 %v2819_v34, 0.0  ;;  %v2960_v24 = vmax.f32 %v2888_v21, 0.0  ;;  %v2891_v56 = vadd.f32 %v3471_v7, %v4940_v43  ;;  %v2882_v8 = vpop.f32.mrb[3].mxu1 }
 0x1c0   : > { %3105 = vst.msk [vmem:[%s4950_s11 + $0x8] sm:$0xf] %vm3102_vm2, %v3397_v55  ;;  %v3398_v16 = vpack.c.bf16 %v2945_v17, %v2945_v17  ;;  %v2958_v20 = vmax.f32 %v2880_v29, 0.0  ;;  %v2883_v26 = vadd.f32 %v4940_v43, %v2882_v8 }
 0x1c1   : > { %3103 = vst.msk [vmem:[%s4950_s11] sm:$0xf] %vm3102_vm2, %v3395_v48  ;;  %v3396_v44 = vpack.c.bf16 %v2943_v38, %v2943_v38  ;;  %v3413_v62 = vpack.c.bf16 %v2960_v24, %v2960_v24  ;;  %v2961_v45 = vmax.f32 %v2891_v56, 0.0 }
 0x1c2   : > { %3106 = vst.msk [vmem:[%s4950_s11 + $0xc] sm:$0xf] %vm3102_vm2, %v3398_v16  ;;  %v3411_v25 = vpack.c.bf16 %v2958_v20, %v2958_v20  ;;  %v2959_v31 = vmax.f32 %v2883_v26, 0.0 }
 0x1c3   : > { %3104 = vst.msk [vmem:[%s4950_s11 + $0x4] sm:$0xf] %vm3102_vm2, %v3396_v44  ;;  %3121 = vst.msk [vmem:[%s4950_s11 + $0x48] sm:$0xf] %vm3102_vm2, %v3413_v62  ;;  %v3414_v22 = vpack.c.bf16 %v2961_v45, %v2961_v45 }
 0x1c4   : > { %3119 = vst.msk [vmem:[%s4950_s11 + $0x40] sm:$0xf] %vm3102_vm2, %v3411_v25  ;;  %v3412_v18 = vpack.c.bf16 %v2959_v31, %v2959_v31 }
 0x1c5   : > { %3122 = vst.msk [vmem:[%s4950_s11 + $0x4c] sm:$0xf] %vm3102_vm2, %v3414_v22 }
 0x1c6   : > { %3120 = vst.msk [vmem:[%s4950_s11 + $0x44] sm:$0xf] %vm3102_vm2, %v3412_v18 }
 0x1f9   : > { %v3458_v50 = vpop.f32.mrb[4].mxu0 }
 0x1fa   : > { %v2840_v11 = vadd.f32 %v3458_v50, %v4940_v43  ;;  %v2831_v52 = vpop.f32.mrb[5].mxu0 }
 0x1fb   : > { %v2832_v46 = vadd.f32 %v4940_v43, %v2831_v52  ;;  %v3459_v2 = vpop.f32.mrb[6].mxu0 }
 0x1fc   : > { %v2948_v37 = vmax.f32 %v2840_v11, 0.0  ;;  %v2843_v40 = vadd.f32 %v3459_v2, %v4940_v43  ;;  %v2834_v54 = vpop.f32.mrb[7].mxu0  ;;  %v3474_v13 = vpop.f32.mrb[4].mxu1 }
 0x1fd   : > { %v2946_v23 = vmax.f32 %v2832_v46, 0.0  ;;  %v2835_v51 = vadd.f32 %v4940_v43, %v2834_v54  ;;  %v2904_v53 = vadd.f32 %v3474_v13, %v4940_v43  ;;  %v2895_v5 = vpop.f32.mrb[5].mxu1 }
 0x1fe   : > { %v3401_v12 = vpack.c.bf16 %v2948_v37, %v2948_v37  ;;  %v2949_v10 = vmax.f32 %v2843_v40, 0.0  ;;  %v2896_v61 = vadd.f32 %v4940_v43, %v2895_v5  ;;  %v3475_v33 = vpop.f32.mrb[6].mxu1 }
 0x1ff   : > { %v3399_v59 = vpack.c.bf16 %v2946_v23, %v2946_v23  ;;  %v2947_v57 = vmax.f32 %v2835_v51, 0.0  ;;  %v2964_v3 = vmax.f32 %v2904_v53, 0.0  ;;  %v2907_v60 = vadd.f32 %v3475_v33, %v4940_v43  ;;  %v2898_v41 = vpop.f32.mrb[7].mxu1 }
 0x200   : > { %3109 = vst.msk [vmem:[%s4950_s11 + $0x18] sm:$0xf] %vm3102_vm2, %v3401_v12  ;;  %v3402_v6 = vpack.c.bf16 %v2949_v10, %v2949_v10  ;;  %v2962_v19 = vmax.f32 %v2896_v61, 0.0  ;;  %v2899_v4 = vadd.f32 %v4940_v43, %v2898_v41 }
 0x201   : > { %3107 = vst.msk [vmem:[%s4950_s11 + $0x10] sm:$0xf] %vm3102_vm2, %v3399_v59  ;;  %v3400_v39 = vpack.c.bf16 %v2947_v57, %v2947_v57  ;;  %v3417_v35 = vpack.c.bf16 %v2964_v3, %v2964_v3  ;;  %v2965_v27 = vmax.f32 %v2907_v60, 0.0 }
 0x202   : > { %3110 = vst.msk [vmem:[%s4950_s11 + $0x1c] sm:$0xf] %vm3102_vm2, %v3402_v6  ;;  %v3415_v58 = vpack.c.bf16 %v2962_v19, %v2962_v19  ;;  %v2963_v28 = vmax.f32 %v2899_v4, 0.0 }
 0x203   : > { %3108 = vst.msk [vmem:[%s4950_s11 + $0x14] sm:$0xf] %vm3102_vm2, %v3400_v39  ;;  %3125 = vst.msk [vmem:[%s4950_s11 + $0x58] sm:$0xf] %vm3102_vm2, %v3417_v35  ;;  %v3418_v42 = vpack.c.bf16 %v2965_v27, %v2965_v27 }
 0x204   : > { %3123 = vst.msk [vmem:[%s4950_s11 + $0x50] sm:$0xf] %vm3102_vm2, %v3415_v58  ;;  %v3416_v47 = vpack.c.bf16 %v2963_v28, %v2963_v28 }
 0x205   : > { %3126 = vst.msk [vmem:[%s4950_s11 + $0x5c] sm:$0xf] %vm3102_vm2, %v3418_v42 }
 0x206   : > { %3124 = vst.msk [vmem:[%s4950_s11 + $0x54] sm:$0xf] %vm3102_vm2, %v3416_v47 }
 0x239   : > { %v3462_v30 = vpop.f32.mrb[8].mxu0 }
 0x23a   : > { %v2856_v14 = vadd.f32 %v3462_v30, %v4940_v43  ;;  %v2847_v32 = vpop.f32.mrb[9].mxu0 }
 0x23b   : > { %v2848_v49 = vadd.f32 %v4940_v43, %v2847_v32  ;;  %v3463_v15 = vpop.f32.mrb[10].mxu0 }
 0x23c   : > { %v2952_v0 = vmax.f32 %v2856_v14, 0.0  ;;  %v2859_v1 = vadd.f32 %v3463_v15, %v4940_v43  ;;  %v2850_v63 = vpop.f32.mrb[11].mxu0 }
 0x23d   : > { %v2950_v34 = vmax.f32 %v2848_v49, 0.0  ;;  %v2851_v55 = vadd.f32 %v4940_v43, %v2850_v63 }
 0x23e   : > { %v3405_v17 = vpack.c.bf16 %v2952_v0, %v2952_v0  ;;  %v2953_v48 = vmax.f32 %v2859_v1, 0.0 }
 0x23f   : > { %v3403_v38 = vpack.c.bf16 %v2950_v34, %v2950_v34  ;;  %v2951_v16 = vmax.f32 %v2851_v55, 0.0 }
 0x240   : > { %3113 = vst.msk [vmem:[%s4950_s11 + $0x28] sm:$0xf] %vm3102_vm2, %v3405_v17  ;;  %v3406_v44 = vpack.c.bf16 %v2953_v48, %v2953_v48 }
 0x241   : > { %3111 = vst.msk [vmem:[%s4950_s11 + $0x20] sm:$0xf] %vm3102_vm2, %v3403_v38  ;;  %v3404_v36 = vpack.c.bf16 %v2951_v16, %v2951_v16 }
 0x242   : > { %v3478_v21 = vpop.f32.mrb[8].mxu1  ;;  %3114 = vst.msk [vmem:[%s4950_s11 + $0x2c] sm:$0xf] %vm3102_vm2, %v3406_v44 }
 0x243   : > { %v2920_v9 = vadd.f32 %v3478_v21, %v4940_v43  ;;  %v2911_v29 = vpop.f32.mrb[9].mxu1  ;;  %3112 = vst.msk [vmem:[%s4950_s11 + $0x24] sm:$0xf] %vm3102_vm2, %v3404_v36 }
 0x244   : > { %v2912_v7 = vadd.f32 %v4940_v43, %v2911_v29  ;;  %v3479_v24 = vpop.f32.mrb[10].mxu1 }
 0x245   : > { %v2968_v56 = vmax.f32 %v2920_v9, 0.0  ;;  %v2923_v8 = vadd.f32 %v3479_v24, %v4940_v43  ;;  %v2914_v20 = vpop.f32.mrb[11].mxu1 }
 0x246   : > { %v2966_v26 = vmax.f32 %v2912_v7, 0.0  ;;  %v2915_v62 = vadd.f32 %v4940_v43, %v2914_v20 }
 0x247   : > { %v3421_v45 = vpack.c.bf16 %v2968_v56, %v2968_v56  ;;  %v2969_v25 = vmax.f32 %v2923_v8, 0.0 }
 0x248   : > { %v3419_v31 = vpack.c.bf16 %v2966_v26, %v2966_v26  ;;  %v2967_v22 = vmax.f32 %v2915_v62, 0.0 }
 0x249   : > { %3129 = vst.msk [vmem:[%s4950_s11 + $0x68] sm:$0xf] %vm3102_vm2, %v3421_v45  ;;  %v3422_v18 = vpack.c.bf16 %v2969_v25, %v2969_v25 }
 0x24a   : > { %3127 = vst.msk [vmem:[%s4950_s11 + $0x60] sm:$0xf] %vm3102_vm2, %v3419_v31  ;;  %v3420_v50 = vpack.c.bf16 %v2967_v22, %v2967_v22 }
 0x24b   : > { %3130 = vst.msk [vmem:[%s4950_s11 + $0x6c] sm:$0xf] %vm3102_vm2, %v3422_v18 }
 0x24c   : > { %3128 = vst.msk [vmem:[%s4950_s11 + $0x64] sm:$0xf] %vm3102_vm2, %v3420_v50 }
 0x275   : > { %v3466_v11 = vpop.f32.mrb[12].mxu0 }
 0x276   : > { %v2872_v52 = vadd.f32 %v3466_v11, %v4940_v43  ;;  %v2863_v46 = vpop.f32.mrb[13].mxu0 }
 0x277   : > { %v2864_v2 = vadd.f32 %v4940_v43, %v2863_v46  ;;  %v3467_v37 = vpop.f32.mrb[14].mxu0 }
 0x278   : > { %v2956_v40 = vmax.f32 %v2872_v52, 0.0  ;;  %v2875_v54 = vadd.f32 %v3467_v37, %v4940_v43  ;;  %v2866_v23 = vpop.f32.mrb[15].mxu0 }
 0x279   : > { %v2954_v51 = vmax.f32 %v2864_v2, 0.0  ;;  %v2867_v12 = vadd.f32 %v4940_v43, %v2866_v23 }
 0x27a   : > { %v3409_v10 = vpack.c.bf16 %v2956_v40, %v2956_v40  ;;  %v2957_v59 = vmax.f32 %v2875_v54, 0.0 }
 0x27b   : > { %v3407_v57 = vpack.c.bf16 %v2954_v51, %v2954_v51  ;;  %v2955_v6 = vmax.f32 %v2867_v12, 0.0 }
 0x27c   : > { %3117 = vst.msk [vmem:[%s4950_s11 + $0x38] sm:$0xf] %vm3102_vm2, %v3409_v10  ;;  %v3410_v39 = vpack.c.bf16 %v2957_v59, %v2957_v59 }
 0x27d   : > { %3115 = vst.msk [vmem:[%s4950_s11 + $0x30] sm:$0xf] %vm3102_vm2, %v3407_v57  ;;  %v3408_v13 = vpack.c.bf16 %v2955_v6, %v2955_v6  ;;  %v3482_v53 = vpop.f32.mrb[12].mxu1 }
 0x27e   : > { %3118 = vst.msk [vmem:[%s4950_s11 + $0x3c] sm:$0xf] %vm3102_vm2, %v3410_v39  ;;  %v2936_v5 = vadd.f32 %v3482_v53, %v4940_v43  ;;  %v2927_v61 = vpop.f32.mrb[13].mxu1 }
 0x27f   : > { %3116 = vst.msk [vmem:[%s4950_s11 + $0x34] sm:$0xf] %vm3102_vm2, %v3408_v13  ;;  %v2928_v33 = vadd.f32 %v4940_v43, %v2927_v61  ;;  %v3483_v3 = vpop.f32.mrb[14].mxu1 }
 0x280   : > { %v2972_v60 = vmax.f32 %v2936_v5, 0.0  ;;  %v2939_v41 = vadd.f32 %v3483_v3, %v4940_v43  ;;  %v2930_v19 = vpop.f32.mrb[15].mxu1 }
 0x281   : > { %v2970_v4 = vmax.f32 %v2928_v33, 0.0  ;;  %v2931_v35 = vadd.f32 %v4940_v43, %v2930_v19 }
 0x282   : > { %v3425_v27 = vpack.c.bf16 %v2972_v60, %v2972_v60  ;;  %v2973_v58 = vmax.f32 %v2939_v41, 0.0 }
 0x283   : > { %v3423_v28 = vpack.c.bf16 %v2970_v4, %v2970_v4  ;;  %v2971_v42 = vmax.f32 %v2931_v35, 0.0 }
 0x284   : > { %3133 = vst.msk [vmem:[%s4950_s11 + $0x78] sm:$0xf] %vm3102_vm2, %v3425_v27  ;;  %v3426_v47 = vpack.c.bf16 %v2973_v58, %v2973_v58 }
 0x285   : > { %3131 = vst.msk [vmem:[%s4950_s11 + $0x70] sm:$0xf] %vm3102_vm2, %v3423_v28  ;;  %v3424_v30 = vpack.c.bf16 %v2971_v42, %v2971_v42 }
 0x286   : > { %3134 = vst.msk [vmem:[%s4950_s11 + $0x7c] sm:$0xf] %vm3102_vm2, %v3426_v47 }
 0x287   : > { %3132 = vst.msk [vmem:[%s4950_s11 + $0x74] sm:$0xf] %vm3102_vm2, %v3424_v30 }
 0x288 PF: > { %s13_s14 = sadd.s32 1, %s3646_s14   ;;  %s5066_s12 = smov %s3642_s13 }
 0x289   : > { %p10_p5 = scmp.ge.s32.totalorder %s13_s14, 4   ;;  %s5067_s13 = smov %s5069_s15 }
 0x28b   :  { %12 = sbr.rel (!%p10_p5) target bundleno = 2 (0x2), region = 85 }

</bundles_post_ra>
